<compile_context>
chip_gen: v7x
topology: tpu7x:2x2x1
jax: 0.10.0
libtpu: 0.0.40
codegen_flags: <defaults>
</compile_context>

<pallas_src>
import functools

import jax
import jax.numpy as jnp
from jax.experimental import pallas as pl
from jax.experimental.pallas import tpu as pltpu

HIDDEN = 200           # hidden_layers in the PyTorch module
HID1_PAD = 256         # 200 padded to lane-friendly width
HID2_PAD = 256         # 201 padded to lane-friendly width
HEAD_PAD = 128         # (output_dim + 1) padded to a full lane tile
TB_MAX = 1024          # max batch tile (x/out tiles only; weights are resident)
SMALL_BATCH = 256      # below this, a single block (grid overhead > TC-split gain)

_PRECISION = jax.lax.Precision.HIGHEST   # true-f32 MXU passes, matches reference


def _student_kernel(x_ref, w1_ref, w2_ref, wh_ref, b_ref, out_ref):
    """Fused forward: two tanh MLP layers + combined actor/critic head."""
    x = x_ref[...]                       # (tb, input_dim)

    b1 = b_ref[0:1, :]                   # (1, HID1_PAD)
    b2 = b_ref[1:2, :]                   # (1, HID2_PAD)
    bh = b_ref[2:3, 0:HEAD_PAD]          # (1, HEAD_PAD)

    # Linear(input_dim, 200) + Tanh   (padded cols stay exactly 0: tanh(0) = 0)
    h1 = jnp.tanh(
        jnp.dot(x, w1_ref[...], preferred_element_type=jnp.float32,
                precision=_PRECISION) + b1
    )
    # Linear(200, 201) + Tanh
    h2 = jnp.tanh(
        jnp.dot(h1, w2_ref[...], preferred_element_type=jnp.float32,
                precision=_PRECISION) + b2
    )
    # Fused actor|critic head: one lane-dense (tb, 128) matmul + unmasked store.
    out_ref[...] = (
        jnp.dot(h2, wh_ref[...], preferred_element_type=jnp.float32,
                precision=_PRECISION) + bh
    )


def _batch_tile(B):
    """Pick the batch tile: one block for tiny batches; otherwise keep >= 2 grid
    steps (v7x has 2 TensorCores sharded over the 'parallel' batch axis)."""
    if B <= SMALL_BATCH:
        return B                                   # block == full dim -> always legal
    half = -(-B // 2)                              # ceil(B / 2)
    half = ((half + 7) // 8) * 8                   # 8-sublane aligned (tb != B case)
    return min(TB_MAX, half)


@functools.partial(jax.jit, static_argnames=("output_dim",))
def student_forward(x, params, output_dim):
    """Run the fused Pallas kernel.

    x: (B, input_dim) float32
    params: dict of padded/fused weights from init_params().
    returns: (actor (B, output_dim), critic (B, 1))
    """
    B, input_dim = x.shape
    tb = _batch_tile(B)
    grid = (pl.cdiv(B, tb),)             # ragged last block handled by Pallas masking

    resident = lambda i: (0, 0)          # weights stay VMEM-resident across the grid

    out = pl.pallas_call(
        _student_kernel,
        out_shape=jax.ShapeDtypeStruct((B, HEAD_PAD), jnp.float32),
        grid=grid,
        in_specs=[
            pl.BlockSpec((tb, input_dim), lambda i: (i, 0)),      # x tile
            pl.BlockSpec((input_dim, HID1_PAD), resident),        # w1
            pl.BlockSpec((HID1_PAD, HID2_PAD), resident),         # w2
            pl.BlockSpec((HID2_PAD, HEAD_PAD), resident),         # fused head
            pl.BlockSpec((3, HID1_PAD), resident),                # packed biases
        ],
        out_specs=pl.BlockSpec((tb, HEAD_PAD), lambda i: (i, 0)),
        compiler_params=pltpu.CompilerParams(
            dimension_semantics=("parallel",),
            vmem_limit_bytes=16 * 1024 * 1024,   # plenty at these sizes on all gens
        ),
    )(x, params["w1"], params["w2"], params["wh"], params["b"])

    # One column slice of the padded (B, 128) output, then split in-register.
    head = out[:, : output_dim + 1]
    actor = head[:, :output_dim]
    critic = head[:, output_dim:]
    return actor, critic


def init_params(key, input_dim, output_dim):
    """PyTorch-Linear-style init, then fuse heads + pad to lane-friendly shapes.

    Returns (padded_params_for_kernel, raw_params_for_reference).
    """
    assert output_dim + 1 <= HEAD_PAD

    def linear(key, fan_in, fan_out):
        kw, kb = jax.random.split(key)
        bound = 1.0 / (fan_in ** 0.5)
        w = jax.random.uniform(kw, (fan_in, fan_out), jnp.float32, -bound, bound)
        b = jax.random.uniform(kb, (fan_out,), jnp.float32, -bound, bound)
        return w, b

    k1, k2, k3, k4 = jax.random.split(key, 4)
    w1, b1 = linear(k1, input_dim, HIDDEN)        # (in, 200)
    w2, b2 = linear(k2, HIDDEN, HIDDEN + 1)       # (200, 201)
    wa, ba = linear(k3, HIDDEN + 1, output_dim)   # (201, out)
    wc, bc = linear(k4, HIDDEN + 1, 1)            # (201, 1)

    # Zero-pad (inert) + fuse the two heads into one lane-dense matmul.
    w1p = jnp.zeros((input_dim, HID1_PAD), jnp.float32).at[:, :HIDDEN].set(w1)
    w2p = jnp.zeros((HID1_PAD, HID2_PAD), jnp.float32).at[:HIDDEN, :HIDDEN + 1].set(w2)
    wh = jnp.concatenate([wa, wc], axis=1)        # (201, out+1)
    whp = jnp.zeros((HID2_PAD, HEAD_PAD), jnp.float32).at[:HIDDEN + 1, :output_dim + 1].set(wh)

    biases = jnp.zeros((3, HID1_PAD), jnp.float32)
    biases = biases.at[0, :HIDDEN].set(b1)
    biases = biases.at[1, :HIDDEN + 1].set(b2)
    biases = biases.at[2, :output_dim].set(ba)
    biases = biases.at[2, output_dim].set(bc[0])

    padded = dict(w1=w1p, w2=w2p, wh=whp, b=biases)
    raw = dict(w1=w1, b1=b1, w2=w2, b2=b2, wa=wa, ba=ba, wc=wc, bc=bc)
    return padded, raw


def student_forward_ref(x, p):
    """Pure-JAX reference (unpadded weights), same pinned precision."""
    dot = functools.partial(jnp.dot, precision=_PRECISION)
    h1 = jnp.tanh(dot(x, p["w1"]) + p["b1"])
    h2 = jnp.tanh(dot(h1, p["w2"]) + p["b2"])
    return dot(h2, p["wa"]) + p["ba"], dot(h2, p["wc"]) + p["bc"]


if __name__ == "__main__":
    key = jax.random.PRNGKey(0)
    k_x, k_x2, k_p = jax.random.split(key, 3)

    input_dim, output_dim = 32, 4
    params, raw_params = init_params(k_p, input_dim, output_dim)

    # Small batch: single grid block.
    batch = 8
    x = jax.random.normal(k_x, (batch, input_dim), jnp.float32)
    actor, critic = student_forward(x, params, output_dim)
    actor = jax.block_until_ready(actor)
    critic = jax.block_until_ready(critic)
    actor_ref, critic_ref = student_forward_ref(x, raw_params)
    assert actor.shape == (batch, output_dim)
    assert critic.shape == (batch, 1)
    assert jnp.allclose(actor, actor_ref, atol=1e-5, rtol=1e-5)
    assert jnp.allclose(critic, critic_ref, atol=1e-5, rtol=1e-5)

    # Larger, non-tile-multiple batch: exercises the 2-step grid (v7x TC split)
    # and the masked ragged last block (no wrapper-side pad/slice).
    batch2 = 300
    x2 = jax.random.normal(k_x2, (batch2, input_dim), jnp.float32)
    actor2, critic2 = student_forward(x2, params, output_dim)
    actor2 = jax.block_until_ready(actor2)
    critic2 = jax.block_until_ready(critic2)
    actor2_ref, critic2_ref = student_forward_ref(x2, raw_params)
    assert actor2.shape == (batch2, output_dim)
    assert critic2.shape == (batch2, 1)
    assert jnp.allclose(actor2, actor2_ref, atol=1e-5, rtol=1e-5)
    assert jnp.allclose(critic2, critic2_ref, atol=1e-5, rtol=1e-5)

    # TODO(synk): StudentModel.validate (env rollout / Categorical sampling) is
    # host-side control flow, not part of the forward pass, so it is not ported.

    print("KERNEL_OK")
</pallas_src>

<mosaic_0001>
module attributes {stable_mosaic.version = 11 : i64} {
  func.func @_student_kernel(%arg0: i32, %arg1: memref<8x32xf32, #tpu.memory_space<vmem>>, %arg2: memref<32x256xf32, #tpu.memory_space<vmem>>, %arg3: memref<256x256xf32, #tpu.memory_space<vmem>>, %arg4: memref<256x128xf32, #tpu.memory_space<vmem>>, %arg5: memref<3x256xf32, #tpu.memory_space<vmem>>, %arg6: memref<8x128xf32, #tpu.memory_space<vmem>>) attributes {dimension_semantics = [#tpu.dimension_semantics<parallel>], iteration_bounds = array<i64: 1>, scalar_prefetch = 0 : i64, scratch_operands = 0 : i64, tpu.core_type = #tpu.core_type<tc>, window_params = [{transform_indices = @transform_0, window_bounds = array<i64: 8, 32>}, {pipeline_mode = #tpu.pipeline_mode<synchronous>, transform_indices = @transform_1, window_bounds = array<i64: 32, 256>}, {pipeline_mode = #tpu.pipeline_mode<synchronous>, transform_indices = @transform_2, window_bounds = array<i64: 256, 256>}, {pipeline_mode = #tpu.pipeline_mode<synchronous>, transform_indices = @transform_3, window_bounds = array<i64: 256, 128>}, {pipeline_mode = #tpu.pipeline_mode<synchronous>, transform_indices = @transform_4, window_bounds = array<i64: 3, 256>}, {transform_indices = @transform_5, window_bounds = array<i64: 8, 128>}]} {
    %c0 = arith.constant 0 : index
    %c0_0 = arith.constant 0 : index
    %0 = vector.load %arg1[%c0, %c0_0] : memref<8x32xf32, #tpu.memory_space<vmem>>, vector<8x32xf32>
    %c0_1 = arith.constant 0 : index
    %c0_2 = arith.constant 0 : index
    %1 = vector.load %arg5[%c0_1, %c0_2] : memref<3x256xf32, #tpu.memory_space<vmem>>, vector<1x256xf32>
    %c1 = arith.constant 1 : index
    %c0_3 = arith.constant 0 : index
    %2 = vector.load %arg5[%c1, %c0_3] : memref<3x256xf32, #tpu.memory_space<vmem>>, vector<1x256xf32>
    %c2 = arith.constant 2 : index
    %c0_4 = arith.constant 0 : index
    %3 = vector.load %arg5[%c2, %c0_4] : memref<3x256xf32, #tpu.memory_space<vmem>>, vector<1x128xf32>
    %c0_5 = arith.constant 0 : index
    %c0_6 = arith.constant 0 : index
    %4 = vector.load %arg2[%c0_5, %c0_6] : memref<32x256xf32, #tpu.memory_space<vmem>>, vector<32x256xf32>
    %cst = arith.constant dense<0.000000e+00> : vector<8x256xf32>
    %5 = tpu.matmul %0, %4, %cst {dimension_numbers = #tpu.dot_dimension_numbers<[1], [0], [0], [1], [0, 0, 1, 1], [], []>, precision = #tpu.contract_precision<fp32>} : vector<8x32xf32>, vector<32x256xf32>, vector<8x256xf32> -> vector<8x256xf32>
    %6 = vector.broadcast %1 : vector<1x256xf32> to vector<8x256xf32>
    %7 = arith.addf %5, %6 : vector<8x256xf32>
    %8 = math.tanh %7 : vector<8x256xf32>
    %c0_7 = arith.constant 0 : index
    %c0_8 = arith.constant 0 : index
    %9 = vector.load %arg3[%c0_7, %c0_8] : memref<256x256xf32, #tpu.memory_space<vmem>>, vector<256x256xf32>
    %cst_9 = arith.constant dense<0.000000e+00> : vector<8x256xf32>
    %10 = tpu.matmul %8, %9, %cst_9 {dimension_numbers = #tpu.dot_dimension_numbers<[1], [0], [0], [1], [0, 0, 1, 1], [], []>, precision = #tpu.contract_precision<fp32>} : vector<8x256xf32>, vector<256x256xf32>, vector<8x256xf32> -> vector<8x256xf32>
    %11 = vector.broadcast %2 : vector<1x256xf32> to vector<8x256xf32>
    %12 = arith.addf %10, %11 : vector<8x256xf32>
    %13 = math.tanh %12 : vector<8x256xf32>
    %c0_10 = arith.constant 0 : index
    %c0_11 = arith.constant 0 : index
    %14 = vector.load %arg4[%c0_10, %c0_11] : memref<256x128xf32, #tpu.memory_space<vmem>>, vector<256x128xf32>
    %cst_12 = arith.constant dense<0.000000e+00> : vector<8x128xf32>
    %15 = tpu.matmul %13, %14, %cst_12 {dimension_numbers = #tpu.dot_dimension_numbers<[1], [0], [0], [1], [0, 0, 1, 1], [], []>, precision = #tpu.contract_precision<fp32>} : vector<8x256xf32>, vector<256x128xf32>, vector<8x128xf32> -> vector<8x128xf32>
    %16 = vector.broadcast %3 : vector<1x128xf32> to vector<8x128xf32>
    %17 = arith.addf %15, %16 : vector<8x128xf32>
    %c0_13 = arith.constant 0 : index
    %c0_14 = arith.constant 0 : index
    %18 = vector.load %arg6[%c0_13, %c0_14] : memref<8x128xf32, #tpu.memory_space<vmem>>, vector<8x128xf32>
    tpu.vector_store %arg6[%c0_13, %c0_14], %17 {strides = array<i32>} : memref<8x128xf32, #tpu.memory_space<vmem>>, vector<8x128xf32>,
    return
  }
  func.func @transform_0(%arg0: i32) -> (i32, i32) {
    %c0_i32 = arith.constant 0 : i32
    %c0_i32_0 = arith.constant 0 : i32
    return %arg0, %c0_i32 : i32, i32
  }
  func.func @transform_1(%arg0: i32) -> (i32, i32) {
    %c0_i32 = arith.constant 0 : i32
    %c0_i32_0 = arith.constant 0 : i32
    %c0_i32_1 = arith.constant 0 : i32
    return %c0_i32, %c0_i32_0 : i32, i32
  }
  func.func @transform_2(%arg0: i32) -> (i32, i32) {
    %c0_i32 = arith.constant 0 : i32
    %c0_i32_0 = arith.constant 0 : i32
    %c0_i32_1 = arith.constant 0 : i32
    return %c0_i32, %c0_i32_0 : i32, i32
  }
  func.func @transform_3(%arg0: i32) -> (i32, i32) {
    %c0_i32 = arith.constant 0 : i32
    %c0_i32_0 = arith.constant 0 : i32
    %c0_i32_1 = arith.constant 0 : i32
    return %c0_i32, %c0_i32_0 : i32, i32
  }
  func.func @transform_4(%arg0: i32) -> (i32, i32) {
    %c0_i32 = arith.constant 0 : i32
    %c0_i32_0 = arith.constant 0 : i32
    %c0_i32_1 = arith.constant 0 : i32
    return %c0_i32, %c0_i32_0 : i32, i32
  }
  func.func @transform_5(%arg0: i32) -> (i32, i32) {
    %c0_i32 = arith.constant 0 : i32
    %c0_i32_0 = arith.constant 0 : i32
    return %arg0, %c0_i32 : i32, i32
  }
}

</mosaic_0001>

<bundles_post_ra>
// kernel: student_forward.1
= control target key start
LH: loop header
LB: loop body
LE: loop exit
PB: predicated region body
PF: predicated region fallthrough
CT: control target
= control target key end

     0   :  { %10 = vsyncpa [#allocation3], 0  ;;  %s5806_s0 = inlined_call_operand.hbm [shape: f32[8,32], index: 0, kind: input, shape index: {}]   ;;  %s5807_s1 = inlined_call_operand.hbm [shape: f32[32,256], index: 1, kind: input, shape index: {}]   ;;  %s5808_s2 = inlined_call_operand.hbm [shape: f32[256,256], index: 2, kind: input, shape index: {}]   ;;  %s5809_s3 = inlined_call_operand.hbm [shape: f32[256,128], index: 3, kind: input, shape index: {}]   ;;  %s5810_s4 = inlined_call_operand.vmem [shape: f32[3,256], index: 4, kind: input, shape index: {}]   ;;  %s5811_s5 = inlined_call_operand.vmem [shape: f32[8,128], index: 5, kind: output, shape index: {}]  }
   0x1   :  { %11 = vsyncpa [#allocation5], 0 }
   0x2   :  { %12 = vsyncpa [#allocation8], 0  ;;  %s3884_s18 = smov [#allocation4]   ;;  %s3790_s22 = scalar_lea.hbm %s5807_s1, 1024 }
   0x3   :  { %s28_s19 = sshll.u32 %s3884_s18, 4  ;;  %p3791_p0 = scmp.ne.s32.totalorder %s5807_s1, %s3790_s22  ;;  %s29_s19 = int_to_ptr.vmem [resolvable:$true] %s28_s19 }
   0x4   :  { %p3794_p1 = scmp.lt.u32.totalorder %s3790_s22, %s5807_s1 }
   0x6   :  { %p3796_p2 = pnand %p3794_p1, %p3791_p0 }
   0x8   :  { %3799 = shalt.err (!%p3796_p2)
}
   0x9   :  { %s3800_s27 = scalar_lea.vmem %s29_s19, 1024  ;;  %p3805_p4 = scmp.lt.s32.totalorder %s29_s19, %s29_s19 }
   0xa   :  { %p3801_p3 = scmp.ne.s32.totalorder %s29_s19, %s3800_s27  ;;  %p3806_p5 = scmp.lt.s32.totalorder %s3800_s27, %s3800_s27 }
   0xc   :  { %p3807_p6 = por %p3806_p5, %p3805_p4 }
   0xe   :  { %p3808_p7 = pnand %p3807_p6, %p3801_p3 }
  0x10   :  { %3811 = shalt.err (!%p3808_p7)
}
  0x11   :  { %s3885_s28 = smov 256   ;;  %s3886_s29 = smov 16  }
  0x12   :  { %34 = dma.hbm_to_vmem [thread:$0]  %s5807_s1, 1024, %s29_s19, [#allocation5], %s3885_s28, %s3885_s28, %s3886_s29  }
  0x13   :  { %s3887_s7 = smov [#allocation2]   ;;  %s3888_s9 = smov [#allocation6]  }
  0x14   :  { %s19_s8 = sshll.u32 %s3887_s7, 4  ;;  %s40_s10 = sshll.u32 %s3888_s9, 4  ;;  %s20_s8 = int_to_ptr.vmem [resolvable:$true] %s19_s8  ;;  %s41_s10 = int_to_ptr.vmem [resolvable:$true] %s40_s10 }
  0x15   :  { %s3812_s13 = scalar_lea.hbm %s5806_s0, 128 }
  0x16   :  { %p3813_p8 = scmp.ne.s32.totalorder %s5806_s0, %s3812_s13  ;;  %p3816_p9 = scmp.lt.u32.totalorder %s3812_s13, %s5806_s0 }
  0x18   :  { %p3818_p10 = pnand %p3816_p9, %p3813_p8 }
  0x1a   :  { %3821 = shalt.err (!%p3818_p10)
}
  0x1b   :  { %s3822_s1 = scalar_lea.vmem %s20_s8, 128  ;;  %p3827_p12 = scmp.lt.s32.totalorder %s20_s8, %s20_s8 }
  0x1c   :  { %p3823_p11 = scmp.ne.s32.totalorder %s20_s8, %s3822_s1  ;;  %p3828_p13 = scmp.lt.s32.totalorder %s3822_s1, %s3822_s1 }
  0x1e   :  { %p3829_p0 = por %p3828_p13, %p3827_p12 }
  0x20   :  { %p3830_p1 = pnand %p3829_p0, %p3823_p11 }
  0x22   :  { %3833 = shalt.err (!%p3830_p1)
}
  0x23   :  { %22 = dma.hbm_to_vmem [thread:$0]  %s5806_s0, 128, %s20_s8, [#allocation3]  }
  0x24   :  { %s3834_s22 = scalar_lea.hbm %s5808_s2, 8192 }
  0x25   :  { %p3835_p2 = scmp.ne.s32.totalorder %s5808_s2, %s3834_s22  ;;  %p3838_p3 = scmp.lt.u32.totalorder %s3834_s22, %s5808_s2 }
  0x27   :  { %p3840_p4 = pnand %p3838_p3, %p3835_p2 }
  0x29   :  { %3843 = shalt.err (!%p3840_p4)
}
  0x2a   :  { %s3844_s27 = scalar_lea.vmem %s41_s10, 8192  ;;  %p3849_p6 = scmp.lt.s32.totalorder %s41_s10, %s41_s10 }
  0x2b   :  { %p3845_p5 = scmp.ne.s32.totalorder %s41_s10, %s3844_s27  ;;  %p3850_p7 = scmp.lt.s32.totalorder %s3844_s27, %s3844_s27 }
  0x2d   :  { %p3851_p8 = por %p3850_p7, %p3849_p6 }
  0x2f   :  { %p3852_p9 = pnand %p3851_p8, %p3845_p5 }
  0x31   :  { %3855 = shalt.err (!%p3852_p9)
}
  0x32   :  { %46 = dma.hbm_to_vmem [thread:$0]  %s5808_s2, 8192, %s41_s10, [#allocation5], %s3885_s28, %s3885_s28, %s3886_s29  }
  0x33   :  { %s3889_s6 = smov [#allocation7]   ;;  %s3856_s11 = scalar_lea.hbm %s5809_s3, 4096 }
  0x34   :  { %s52_s7 = sshll.u32 %s3889_s6, 4  ;;  %p3857_p10 = scmp.ne.s32.totalorder %s5809_s3, %s3856_s11  ;;  %s53_s7 = int_to_ptr.vmem [resolvable:$true] %s52_s7 }
  0x35   :  { %p3860_p11 = scmp.lt.u32.totalorder %s3856_s11, %s5809_s3 }
  0x37   :  { %p3862_p12 = pnand %p3860_p11, %p3857_p10 }
  0x39   :  { %3865 = shalt.err (!%p3862_p12)
}
  0x3a   :  { %s3866_s16 = scalar_lea.vmem %s53_s7, 4096  ;;  %p3871_p0 = scmp.lt.s32.totalorder %s53_s7, %s53_s7 }
  0x3b   :  { %p3867_p13 = scmp.ne.s32.totalorder %s53_s7, %s3866_s16  ;;  %p3872_p1 = scmp.lt.s32.totalorder %s3866_s16, %s3866_s16 }
  0x3d   :  { %p3873_p2 = por %p3872_p1, %p3871_p0 }
  0x3f   :  { %p3874_p3 = pnand %p3873_p2, %p3867_p13 }
  0x41   :  { %3877 = shalt.err (!%p3874_p3)
}
  0x42   :  { %s3890_s2 = smov 128   ;;  %s3891_s28 = smov 8  }
  0x43   :  { %58 = dma.hbm_to_vmem [thread:$0]  %s5809_s3, 4096, %s53_s7, [#allocation8], %s3890_s2, %s3890_s2, %s3891_s28  }
  0x44   :  { %3878 = dma.done.wait [#allocation3], 128  }
  0x45   :  { %3879 = vsyncadd [#allocation3], 4294967168 }
  0x46   :  { %3880 = dma.done.wait [#allocation5], 9216  }
  0x47   :  { %3881 = vsyncadd [#allocation5], 4294958080 }
  0x48   :  { %3882 = dma.done.wait [#allocation8], 4096  }
  0x49   :  { %3883 = vsyncadd [#allocation8], 4294963200  ;;  %v3892_v0 = vmov 0.0   ;;  %v79_v1 = vld [vmem:[#allocation4 + $0x8] sm:$0xff]  ;;  %v81_v2 = vld [vmem:[#allocation4 + $0x18] sm:$0xff]  ;;  %vm97_vm0 = vcmask 261120  }
  0x4a   :  { %173 = vmatprep.mubr.f32.mxu0 %v3892_v0  ;;  %v78_v3 = vld [vmem:[#allocation4] sm:$0xff]  ;;  %v101_v4 = vand.u32 4294901760, %v79_v1  ;;  %v105_v5 = vand.u32 4294901760, %v81_v2  ;;  %v80_v6 = vld [vmem:[#allocation4 + $0x10] sm:$0xff]  ;;  %v83_v8 = vld [vmem:[#allocation4 + $0x28] sm:$0xff] }
  0x4b   :  { %v103_v7 = vand.u32 4294901760, %v78_v3  ;;  %v85_v9 = vld [vmem:[#allocation4 + $0x38] sm:$0xff]  ;;  %v107_v10 = vand.u32 4294901760, %v80_v6  ;;  %v109_v11 = vand.u32 4294901760, %v83_v8  ;;  %v82_v13 = vld [vmem:[#allocation4 + $0x20] sm:$0xff]  ;;  %v84_v14 = vld [vmem:[#allocation4 + $0x30] sm:$0xff] }
  0x4c   :  { %v113_v12 = vand.u32 4294901760, %v85_v9  ;;  %v73_v15 = vld [vmem:[#allocation2] sm:$0xff]  ;;  %v3978_v16 = vpack.c.bf16 %v105_v5, %v101_v4  ;;  %v3980_v17 = vsub.f32 %v79_v1, %v101_v4  ;;  %v3982_v18 = vsub.f32 %v81_v2, %v105_v5  ;;  %v4037_v58 = vld [vmem:[#allocation6 + $0x8] sm:$0xff]  ;;  %v4046_v1 = vld [vmem:[#allocation6] sm:$0xff] }
  0x4d   :  { %v3984_v19 = vsub.f32 %v78_v3, %v103_v7  ;;  %v3986_v20 = vpack.c.bf16 %v107_v10, %v103_v7  ;;  %v3988_v21 = vsub.f32 %v80_v6, %v107_v10  ;;  %v3992_v23 = vsub.f32 %v83_v8, %v109_v11  ;;  %v4039_v59 = vld [vmem:[#allocation6 + $0x18] sm:$0xff]  ;;  %v4048_v2 = vld [vmem:[#allocation6 + $0x10] sm:$0xff]  ;;  %v4050_v3 = vld [vmem:[#allocation6 + $0x28] sm:$0xff] }
  0x4e   :  { %v3990_v22 = vpack.c.bf16 %v113_v12, %v109_v11  ;;  %3126 = vmatprep.subr.bf16.mxu0 %v3978_v16  ;;  %v3995_v24 = vsub.f32 %v85_v9, %v113_v12  ;;  %v111_v25 = vand.u32 4294901760, %v82_v13  ;;  %v115_v26 = vand.u32 4294901760, %v84_v14  ;;  %v4058_v8 = vld [vmem:[#allocation6 + $0x38] sm:$0xff]  ;;  %v4060_v9 = vld [vmem:[#allocation6 + $0x20] sm:$0xff] }
  0x4f   :  { %v99_v27 = vsel %vm97_vm0, %v73_v15, 0  ;;  %3128 = vmatpush1.bf16.msra.mxu0 %v3986_v20  ;;  %v187_v29 = vand.u32 4294901760, %v3980_v17  ;;  %v199_v30 = vand.u32 4294901760, %v3982_v18  ;;  %v193_v31 = vand.u32 4294901760, %v3984_v19 }
  0x50   :  { %v3999_v28 = vand.u32 4294901760, %v99_v27  ;;  %3130 = vmatprep.subr.bf16.mxu0 %v3990_v22  ;;  %v4005_v32 = vpack.c.bf16 %v115_v26, %v111_v25  ;;  %v4007_v33 = vsub.f32 %v82_v13, %v111_v25  ;;  %v4009_v34 = vsub.f32 %v84_v14, %v115_v26 }
  0x51   :  { %v205_v35 = vand.u32 4294901760, %v3988_v21  ;;  %v188_v37 = vsub.f32 %v3980_v17, %v187_v29  ;;  %v200_v38 = vsub.f32 %v3982_v18, %v199_v30  ;;  %v194_v39 = vsub.f32 %v3984_v19, %v193_v31 }
  0x52   :  { %v4013_v36 = vsub.f32 %v99_v27, %v3999_v28  ;;  %v211_v41 = vand.u32 4294901760, %v3992_v23  ;;  %v223_v42 = vand.u32 4294901760, %v3995_v24  ;;  %v217_v43 = vand.u32 4294901760, %v4007_v33 }
  0x53   :  { %v206_v40 = vsub.f32 %v3988_v21, %v205_v35  ;;  %3132 = vmatpush1.bf16.msra.mxu0 %v4005_v32  ;;  %v189_v45 = vand.u32 4294901760, %v188_v37  ;;  %v201_v46 = vand.u32 4294901760, %v200_v38  ;;  %v195_v47 = vand.u32 4294901760, %v194_v39 }
  0x54   :  { %v176_v44 = vand.u32 4294901760, %v4013_v36  ;;  %v212_v49 = vsub.f32 %v3992_v23, %v211_v41  ;;  %v224_v50 = vsub.f32 %v3995_v24, %v223_v42  ;;  %v218_v51 = vsub.f32 %v4007_v33, %v217_v43 }
  0x55   :  { %v207_v48 = vand.u32 4294901760, %v206_v40  ;;  %v3133_v53 = vpack.c.bf16 %v201_v46, %v189_v45  ;;  %v229_v54 = vand.u32 4294901760, %v4009_v34  ;;  %v3141_v63 = vpack.c.bf16 %v3982_v18, %v3980_v17 }
  0x56   :  { %v177_v52 = vsub.f32 %v4013_v36, %v176_v44  ;;  %v213_v56 = vand.u32 4294901760, %v212_v49  ;;  %v225_v57 = vand.u32 4294901760, %v224_v50  ;;  %v219_v61 = vand.u32 4294901760, %v218_v51 }
  0x57   :  { %v3135_v55 = vpack.c.bf16 %v207_v48, %v195_v47  ;;  %3134 = vmatprep.subr.bf16.mxu0 %v3133_v53  ;;  %v230_v62 = vsub.f32 %v4009_v34, %v229_v54  ;;  %v3143_v5 = vpack.c.bf16 %v3988_v21, %v3984_v19  ;;  %v3145_v6 = vpack.c.bf16 %v3995_v24, %v3992_v23  ;;  %v4072_v19 = vld [vmem:[#allocation6 + $0x30] sm:$0xff] }
  0x58   :  { %v178_v60 = vand.u32 4294901760, %v177_v52  ;;  %v3137_v4 = vpack.c.bf16 %v225_v57, %v213_v56  ;;  %v3147_v7 = vpack.c.bf16 %v4009_v34, %v4007_v33  ;;  %v4062_v11 = vpack.c.bf16 %v199_v30, %v187_v29 }
  0x59   :  { %v231_v10 = vand.u32 4294901760, %v230_v62  ;;  %v4064_v12 = vpack.c.bf16 %v205_v35, %v193_v31  ;;  %v721_v13 = vand.u32 4294901760, %v4037_v58  ;;  %v725_v14 = vand.u32 4294901760, %v4039_v59 }
  0x5a   :  { %179 = vmatmul.mubr.f32.vlgmr.msra.gmra.mrb[0].mxu0 %v178_v60  ;;  %v723_v15 = vand.u32 4294901760, %v4046_v1  ;;  %v727_v17 = vand.u32 4294901760, %v4048_v2  ;;  %v729_v18 = vand.u32 4294901760, %v4050_v3  ;;  %v733_v26 = vand.u32 4294901760, %v4058_v8  ;;  %v4139_v60 = vld [vmem:[#allocation6 + $0x48] sm:$0xff] }
  0x5b   :  { %3136 = vmatpush1.bf16.msra.mxu0 %v3135_v55  ;;  %289 = vmatprep.mubr.f32.mxu0 %v3892_v0  ;;  %v3139_v21 = vpack.c.bf16 %v231_v10, %v219_v61  ;;  %v4077_v25 = vsub.f32 %v4037_v58, %v721_v13  ;;  %v5821_v27 = vand.u32 4294901760, %v4060_v9  ;;  %v4084_v29 = vsub.f32 %v4039_v59, %v725_v14  ;;  %v4149_v10 = vld [vmem:[#allocation6 + $0x58] sm:$0xff] }
  0x5c   :  { %3138 = vmatprep.subr.bf16.mxu0 %v3137_v4  ;;  %v4089_v30 = vsub.f32 %v4046_v1, %v723_v15  ;;  %v4094_v31 = vsub.f32 %v4048_v2, %v727_v17  ;;  %v4099_v35 = vsub.f32 %v4050_v3, %v729_v18  ;;  %v4105_v38 = vsub.f32 %v4058_v8, %v733_v26 }
  0x5d   :  { %v5818_v37 = vand.u32 4294901760, %v4077_v25  ;;  %v5819_v39 = vand.u32 4294901760, %v4072_v19  ;;  %v4111_v40 = vsub.f32 %v4060_v9, %v5821_v27  ;;  %v5815_v45 = vand.u32 4294901760, %v4084_v29 }
  0x5e   :  { %v5814_v46 = vand.u32 4294901760, %v4089_v30  ;;  %v5813_v47 = vand.u32 4294901760, %v4094_v31  ;;  %v5812_v48 = vand.u32 4294901760, %v4099_v35  ;;  %v5816_v50 = vand.u32 4294901760, %v4105_v38 }
  0x5f   :  { %3140 = vmatpush1.bf16.msra.mxu0 %v3139_v21  ;;  %v869_v49 = vsub.f32 %v4077_v25, %v5818_v37  ;;  %v5817_v51 = vand.u32 4294901760, %v4111_v40  ;;  %v4125_v52 = vsub.f32 %v4072_v19, %v5819_v39  ;;  %v881_v53 = vsub.f32 %v4084_v29, %v5815_v45  ;;  %v4158_v39 = vld [vmem:[#allocation6 + $0x50] sm:$0xff] }
  0x60   :  { %3142 = vmatprep.subr.bf16.mxu0 %v3141_v63  ;;  %v875_v55 = vsub.f32 %v4089_v30, %v5814_v46  ;;  %v887_v56 = vsub.f32 %v4094_v31, %v5813_v47  ;;  %v893_v57 = vsub.f32 %v4099_v35, %v5812_v48  ;;  %v905_v62 = vsub.f32 %v4105_v38, %v5816_v50 }
  0x61   :  { %v870_v61 = vand.u32 4294901760, %v869_v49  ;;  %v899_v63 = vsub.f32 %v4111_v40, %v5817_v51  ;;  %v5820_v4 = vand.u32 4294901760, %v4125_v52  ;;  %v882_v21 = vand.u32 4294901760, %v881_v53  ;;  %v4152_v49 = vld [vmem:[#allocation6 + $0x40] sm:$0xff] }
  0x62   :  { %291 = vmatmul.mubr.f32.vlgmr.msra.gmra.mrb[0].mxu0 %v3999_v28  ;;  %v876_v48 = vand.u32 4294901760, %v875_v55  ;;  %v888_v47 = vand.u32 4294901760, %v887_v56  ;;  %v894_v46 = vand.u32 4294901760, %v893_v57  ;;  %v906_v45 = vand.u32 4294901760, %v905_v62  ;;  %v4169_v57 = vld [vmem:[#allocation6 + $0x78] sm:$0xff] }
  0x63   :  { %3144 = vmatpush1.bf16.msra.mxu0 %v3143_v5  ;;  %377 = vmatprep.mubr.f32.mxu0 %v3892_v0  ;;  %v900_v50 = vand.u32 4294901760, %v899_v63  ;;  %v911_v51 = vsub.f32 %v4125_v52, %v5820_v4  ;;  %v5835_v37 = vand.u32 4294901760, %v4139_v60  ;;  %v4160_v5 = vld [vmem:[#allocation6 + $0x68] sm:$0xff]  ;;  %v4166_v53 = vpack.c.bf16 %v223_v42, %v211_v41 }
  0x64   :  { %3146 = vmatprep.subr.bf16.mxu0 %v3145_v6  ;;  %v3237_v55 = vpack.c.bf16 %v882_v21, %v870_v61  ;;  %v3239_v6 = vpack.c.bf16 %v888_v47, %v876_v48  ;;  %v5833_v56 = vand.u32 4294901760, %v4149_v10  ;;  %v3241_v62 = vpack.c.bf16 %v906_v45, %v894_v46  ;;  %v4193_v45 = vld [vmem:[#allocation6 + $0x60] sm:$0xff] }
  0x65   :  { %v912_v63 = vand.u32 4294901760, %v911_v51  ;;  %v4174_v4 = vsub.f32 %v4139_v60, %v5835_v37  ;;  %v5832_v27 = vand.u32 4294901760, %v4152_v49  ;;  %v4184_v23 = vpack.c.bf16 %v229_v54, %v217_v43 }
  0x66   :  { %3238 = vmatprep.subr.bf16.mxu1 %v3237_v55  ;;  %v4189_v24 = vsub.f32 %v4149_v10, %v5833_v56  ;;  %v5830_v41 = vand.u32 4294901760, %v4158_v39  ;;  %v5826_v42 = vand.u32 4294901760, %v4160_v5  ;;  %v5824_v54 = vand.u32 4294901760, %v4169_v57 }
  0x67   :  { %3148 = vmatpush1.bf16.msra.mxu0 %v3147_v7  ;;  %3240 = vmatpush1.bf16.msra.mxu1 %v3239_v6  ;;  %v3243_v33 = vpack.c.bf16 %v912_v63, %v900_v50  ;;  %v5823_v34 = vand.u32 4294901760, %v4174_v4  ;;  %v4200_v43 = vsub.f32 %v4152_v49, %v5832_v27  ;;  %v4203_v7 = vld [vmem:[#allocation6 + $0x70] sm:$0xff]  ;;  %v4210_v47 = vpack.c.bf16 %v725_v14, %v721_v13 }
  0x68   :  { %3150 = vmatprep.subr.bf16.mxu0 %v3978_v16  ;;  %3242 = vmatprep.subr.bf16.mxu1 %v3241_v62  ;;  %v5822_v46 = vand.u32 4294901760, %v4189_v24  ;;  %v4215_v48 = vsub.f32 %v4158_v39, %v5830_v41  ;;  %v4220_v50 = vsub.f32 %v4160_v5, %v5826_v42  ;;  %v4230_v13 = vsub.f32 %v4169_v57, %v5824_v54  ;;  %v4264_v42 = vld [vmem:[#allocation6 + $0x98] sm:$0xff]  ;;  %v4276_v41 = vld [vmem:[#allocation6 + $0x80] sm:$0xff] }
  0x69   :  { %6109 = vst [vmem:[#allocation12_spill] sm:$0xff] %v4210_v47  ;;  %v917_v58 = vsub.f32 %v4174_v4, %v5823_v34  ;;  %v5825_v59 = vand.u32 4294901760, %v4200_v43  ;;  %v5827_v14 = vand.u32 4294901760, %v4193_v45  ;;  %v5831_v55 = vand.u32 4294901760, %v4203_v7 }
  0x6a   :  { %380 = vmatmul.mubr.f32.vlgmr.msra.gmra.mrb[0].mxu0 %v4013_v36  ;;  %v929_v51 = vsub.f32 %v4189_v24, %v5822_v46  ;;  %v5829_v61 = vand.u32 4294901760, %v4215_v48  ;;  %v5828_v21 = vand.u32 4294901760, %v4220_v50  ;;  %v5834_v63 = vand.u32 4294901760, %v4230_v13 }
  0x6b   :  { %3152 = vmatpush1.bf16.msra.mxu0 %v3986_v20  ;;  %458 = vmatprep.mubr.f32.mxu0 %v3892_v0  ;;  %v918_v6 = vand.u32 4294901760, %v917_v58  ;;  %v923_v62 = vsub.f32 %v4200_v43, %v5825_v59  ;;  %v4249_v46 = vsub.f32 %v4193_v45, %v5827_v14  ;;  %v4260_v58 = vsub.f32 %v4203_v7, %v5831_v55  ;;  %v4262_v59 = vld [vmem:[#allocation6 + $0x88] sm:$0xff] }
  0x6c   :  { %3154 = vmatprep.subr.bf16.mxu0 %v3990_v22  ;;  %3244 = vmatpush1.bf16.msra.mxu1 %v3243_v33  ;;  %v930_v34 = vand.u32 4294901760, %v929_v51  ;;  %v935_v54 = vsub.f32 %v4215_v48, %v5829_v61  ;;  %v941_v33 = vsub.f32 %v4220_v50, %v5828_v21  ;;  %v4270_v51 = vpack.c.bf16 %v727_v17, %v723_v15 }
  0x6d   :  { %v924_v14 = vand.u32 4294901760, %v923_v62  ;;  %v953_v21 = vsub.f32 %v4230_v13, %v5834_v63  ;;  %v5837_v61 = vand.u32 4294901760, %v4249_v46  ;;  %v5836_v62 = vand.u32 4294901760, %v4260_v58  ;;  %v4286_v63 = vld [vmem:[#allocation6 + $0x90] sm:$0xff] }
  0x6e   :  { %6110 = vst [vmem:[#allocation13_spill] sm:$0xff] %v4270_v51  ;;  %v3245_v55 = vpack.c.bf16 %v930_v34, %v918_v6  ;;  %v936_v27 = vand.u32 4294901760, %v935_v54  ;;  %v942_v56 = vand.u32 4294901760, %v941_v33  ;;  %v5851_v15 = vand.u32 4294901760, %v4262_v59  ;;  %v4300_v6 = vld [vmem:[#allocation6 + $0xb8] sm:$0xff] }
  0x6f   :  { %3156 = vmatpush1.bf16.msra.mxu0 %v4005_v32  ;;  %v954_v1 = vand.u32 4294901760, %v953_v21  ;;  %v947_v2 = vsub.f32 %v4249_v46, %v5837_v61  ;;  %v5848_v17 = vand.u32 4294901760, %v4264_v42  ;;  %v4292_v34 = vpack.c.bf16 %v733_v26, %v729_v18  ;;  %v4298_v21 = vld [vmem:[#allocation6 + $0xa8] sm:$0xff] }
  0x70   :  { %3158 = vmatprep.subr.bf16.mxu0 %v4062_v11  ;;  %3246 = vmatprep.subr.bf16.mxu1 %v3245_v55  ;;  %v3247_v37 = vpack.c.bf16 %v936_v27, %v924_v14  ;;  %v959_v11 = vsub.f32 %v4260_v58, %v5836_v62  ;;  %v5844_v54 = vand.u32 4294901760, %v4276_v41  ;;  %v4307_v3 = vsub.f32 %v4262_v59, %v5851_v15 }
  0x71   :  { %6111 = vst [vmem:[#allocation14_spill] sm:$0xff] %v4292_v34  ;;  %v3249_v27 = vpack.c.bf16 %v954_v1, %v942_v56  ;;  %v948_v14 = vand.u32 4294901760, %v947_v2  ;;  %v4312_v8 = vsub.f32 %v4264_v42, %v5848_v17  ;;  %v6112_v36 = vand.u32 4294901760, %v4060_v9  ;;  %v4333_v1 = vld [vmem:[#allocation6 + $0xa0] sm:$0xff]  ;;  %v4335_v2 = vld [vmem:[#allocation6 + $0xb0] sm:$0xff] }
  0x72   :  { %462 = vmatmul.mubr.f32.vlgmr.msra.gmra.mrb[0].mxu0 %v176_v44  ;;  %v960_v18 = vand.u32 4294901760, %v959_v11  ;;  %v6113_v44 = vand.u32 4294901760, %v4072_v19  ;;  %v5842_v56 = vand.u32 4294901760, %v4286_v63  ;;  %v4326_v55 = vsub.f32 %v4276_v41, %v5844_v54  ;;  %3248 = vmatpush1.bf16.msra.mxu1 %v3247_v37 }
  0x73   :  { %3160 = vmatpush1.bf16.msra.mxu0 %v4064_v12  ;;  %556 = vmatprep.mubr.f32.mxu0 %v3892_v0  ;;  %v5839_v12 = vand.u32 4294901760, %v4307_v3  ;;  %v5838_v33 = vand.u32 4294901760, %v4312_v8  ;;  %v5841_v9 = vand.u32 4294901760, %v4298_v21  ;;  %v5840_v19 = vand.u32 4294901760, %v4300_v6 }
  0x74   :  { %v4320_v26 = vpack.c.bf16 %v6113_v44, %v6112_v36  ;;  %3162 = vmatprep.subr.bf16.mxu0 %v4166_v53  ;;  %3250 = vmatprep.subr.bf16.mxu1 %v3249_v27  ;;  %v3251_v11 = vpack.c.bf16 %v960_v18, %v948_v14  ;;  %v6115_v36 = vand.u32 4294901760, %v4139_v60  ;;  %v6116_v44 = vand.u32 4294901760, %v4149_v10 }
  0x75   :  { %v5843_v37 = vand.u32 4294901760, %v4326_v55  ;;  %v4347_v62 = vsub.f32 %v4286_v63, %v5842_v56  ;;  %v965_v61 = vsub.f32 %v4307_v3, %v5839_v12  ;;  %v977_v27 = vsub.f32 %v4312_v8, %v5838_v33 }
  0x76   :  { %6114 = vst [vmem:[#allocation15_spill] sm:$0xff] %v4320_v26  ;;  %v4341_v53 = vpack.c.bf16 %v6116_v44, %v6115_v36  ;;  %v4358_v60 = vsub.f32 %v4298_v21, %v5841_v9  ;;  %v4363_v10 = vsub.f32 %v4300_v6, %v5840_v19  ;;  %v5846_v36 = vand.u32 4294901760, %v4333_v1  ;;  %3252 = vmatpush1.bf16.msra.mxu1 %v3251_v11 }
  0x77   :  { %3164 = vmatpush1.bf16.msra.mxu0 %v4184_v23  ;;  %v971_v14 = vsub.f32 %v4326_v55, %v5843_v37  ;;  %v5845_v18 = vand.u32 4294901760, %v4347_v62  ;;  %v5847_v44 = vand.u32 4294901760, %v4335_v2  ;;  %v966_v33 = vand.u32 4294901760, %v965_v61  ;;  %v4375_v23 = vld [vmem:[#allocation6 + $0xc8] sm:$0xff]  ;;  %v4390_v61 = vld [vmem:[#allocation6 + $0xd8] sm:$0xff] }
  0x78   :  { %6117 = vst [vmem:[#allocation16_spill] sm:$0xff] %v4341_v53  ;;  %3166 = vmatprep.subr.bf16.mxu0 %v3978_v16  ;;  %v978_v12 = vand.u32 4294901760, %v977_v27  ;;  %v5850_v19 = vand.u32 4294901760, %v4358_v60  ;;  %v5849_v9 = vand.u32 4294901760, %v4363_v10  ;;  %v4383_v54 = vsub.f32 %v4333_v1, %v5846_v36 }
  0x79   :  { %v972_v56 = vand.u32 4294901760, %v971_v14  ;;  %v983_v37 = vsub.f32 %v4347_v62, %v5845_v18  ;;  %v4388_v16 = vsub.f32 %v4335_v2, %v5847_v44  ;;  %v6118_v27 = vand.u32 4294901760, %v4152_v49 }
  0x7a   :  { %558 = vmatmul.mubr.f32.vlgmr.msra.gmra.mrb[0].mxu0 %v3999_v28  ;;  %v3253_v11 = vpack.c.bf16 %v978_v12, %v966_v33  ;;  %v6119_v14 = vand.u32 4294901760, %v4158_v39  ;;  %v989_v36 = vsub.f32 %v4358_v60, %v5850_v19  ;;  %v1001_v44 = vsub.f32 %v4363_v10, %v5849_v9  ;;  %v4410_v33 = vld [vmem:[#allocation6 + $0xc0] sm:$0xff] }
  0x7b   :  { %3168 = vmatpush1.bf16.msra.mxu0 %v3986_v20  ;;  %636 = vmatprep.mubr.f32.mxu0 %v3892_v0  ;;  %v984_v17 = vand.u32 4294901760, %v983_v37  ;;  %v5853_v12 = vand.u32 4294901760, %v4383_v54  ;;  %v5852_v49 = vand.u32 4294901760, %v4388_v16  ;;  %v6121_v20 = vand.u32 4294901760, %v4160_v5  ;;  %v4433_v5 = vld [vmem:[#allocation6 + $0xe8] sm:$0xff] }
  0x7c   :  { %v4397_v18 = vpack.c.bf16 %v6119_v14, %v6118_v27  ;;  %v4412_v27 = vld [vmem:[#allocation6 + $0xd0] sm:$0xff]  ;;  %3170 = vmatprep.subr.bf16.mxu0 %v3990_v22  ;;  %3254 = vmatprep.subr.bf16.mxu1 %v3253_v11  ;;  %v990_v14 = vand.u32 4294901760, %v989_v36  ;;  %v1002_v9 = vand.u32 4294901760, %v1001_v44  ;;  %v6122_v0 = vand.u32 4294901760, %v4169_v57 }
  0x7d   :  { %v5854_v19 = vand.u32 4294901760, %v4390_v61  ;;  %v3255_v15 = vpack.c.bf16 %v984_v17, %v972_v56  ;;  %v995_v39 = vsub.f32 %v4383_v54, %v5853_v12  ;;  %v1007_v22 = vsub.f32 %v4388_v16, %v5852_v49 }
  0x7e   :  { %6120 = vst [vmem:[#allocation17_spill] sm:$0xff] %v4397_v18  ;;  %v4419_v37 = vpack.c.bf16 %v6122_v0, %v6121_v20  ;;  %v6124_v36 = vand.u32 4294901760, %v4375_v23  ;;  %v3257_v57 = vpack.c.bf16 %v1002_v9, %v990_v14  ;;  %v5855_v56 = vand.u32 4294901760, %v4410_v33  ;;  %v4442_v20 = vld [vmem:[#allocation6 + $0xf8] sm:$0xff] }
  0x7f   :  { %v4438_v17 = vsub.f32 %v4390_v61, %v5854_v19  ;;  %v5856_v11 = vand.u32 4294901760, %v4412_v27  ;;  %3172 = vmatpush1.bf16.msra.mxu0 %v4005_v32  ;;  %3256 = vmatpush1.bf16.msra.mxu1 %v3255_v15  ;;  %v996_v0 = vand.u32 4294901760, %v995_v39  ;;  %v6127_v49 = vand.u32 4294901760, %v4193_v45  ;;  %v4465_v15 = vld [vmem:[#allocation6 + $0xe0] sm:$0xff] }
  0x80   :  { %6123 = vst [vmem:[#allocation18_spill] sm:$0xff] %v4419_v37  ;;  %v4431_v44 = vsub.f32 %v4375_v23, %v6124_v36  ;;  %v1008_v36 = vand.u32 4294901760, %v1007_v22  ;;  %v6128_v9 = vand.u32 4294901760, %v4203_v7  ;;  %3174 = vmatprep.subr.bf16.mxu0 %v4210_v47  ;;  %3258 = vmatprep.subr.bf16.mxu1 %v3257_v57  ;;  %v4457_v32 = vsub.f32 %v4410_v33, %v5855_v56 }
  0x81   :  { %6126 = vst [vmem:[#allocation20_spill] sm:$0xff] %v4438_v17  ;;  %v5858_v19 = vand.u32 4294901760, %v4438_v17  ;;  %v4462_v45 = vsub.f32 %v4412_v27, %v5856_v11  ;;  %v6132_v57 = vand.u32 4294901760, %v4262_v59  ;;  %v5861_v11 = vand.u32 4294901760, %v4442_v20 }
  0x82   :  { %6125 = vst [vmem:[#allocation19_spill] sm:$0xff] %v4431_v44  ;;  %v4449_v14 = vpack.c.bf16 %v6128_v9, %v6127_v49  ;;  %v5857_v12 = vand.u32 4294901760, %v4431_v44  ;;  %6130 = vst [vmem:[#allocation22_spill] sm:$0xff] %v4457_v32  ;;  %v4467_v49 = vld [vmem:[#allocation6 + $0xf0] sm:$0xff]  ;;  %v3259_v39 = vpack.c.bf16 %v1008_v36, %v996_v0  ;;  %v6133_v9 = vand.u32 4294901760, %v4264_v42  ;;  %638 = vmatmul.mubr.f32.vlgmr.msra.gmra.mrb[0].mxu0 %v3999_v28 }
  0x83   :  { %6131 = vst [vmem:[#allocation23_spill] sm:$0xff] %v4462_v45  ;;  %v1025_v7 = vsub.f32 %v4438_v17, %v5858_v19  ;;  %v5864_v0 = vand.u32 4294901760, %v4457_v32  ;;  %v5867_v36 = vand.u32 4294901760, %v4462_v45  ;;  %3176 = vmatpush1.bf16.msra.mxu0 %v4270_v51  ;;  %v4494_v28 = vsub.f32 %v4442_v20, %v5861_v11  ;;  %v4506_v51 = vld [vmem:[#allocation6 + $0x108] sm:$0xff] }
  0x84   :  { %6129 = vst [vmem:[#allocation21_spill] sm:$0xff] %v4449_v14  ;;  %v1013_v22 = vsub.f32 %v4431_v44, %v5857_v12  ;;  %v4476_v56 = vpack.c.bf16 %v6133_v9, %v6132_v57  ;;  %v6135_v12 = vand.u32 4294901760, %v4433_v5  ;;  %3260 = vmatpush1.bf16.msra.mxu1 %v3259_v39  ;;  %3178 = vmatprep.subr.bf16.mxu0 %v4292_v34  ;;  %v6138_v11 = vand.u32 4294901760, %v4276_v41  ;;  %v4537_v44 = vld [vmem:[#allocation6 + $0x100] sm:$0xff] }
  0x85   :  { %6137 = vst [vmem:[#allocation26_spill] sm:$0xff] %v4494_v28  ;;  %v1026_v19 = vand.u32 4294901760, %v1025_v7  ;;  %v1031_v39 = vsub.f32 %v4462_v45, %v5867_v36  ;;  %v6139_v57 = vand.u32 4294901760, %v4286_v63  ;;  %v5876_v7 = vand.u32 4294901760, %v4494_v28 }
  0x86   :  { %6134 = vst [vmem:[#allocation24_spill] sm:$0xff] %v4476_v56  ;;  %v4488_v59 = vsub.f32 %v4433_v5, %v6135_v12  ;;  %v1014_v42 = vand.u32 4294901760, %v1013_v22  ;;  %v1019_v12 = vsub.f32 %v4457_v32, %v5864_v0  ;;  %v6141_v34 = vand.u32 4294901760, %v4465_v15  ;;  %v4525_v22 = vld [vmem:[#allocation6 + $0x118] sm:$0xff] }
  0x87   :  { %v4512_v9 = vpack.c.bf16 %v6139_v57, %v6138_v11  ;;  %v6143_v47 = vand.u32 4294901760, %v4467_v49  ;;  %v1032_v32 = vand.u32 4294901760, %v1031_v39  ;;  %3180 = vmatpush1.bf16.msra.mxu0 %v4320_v26  ;;  %v6146_v39 = vand.u32 4294901760, %v4298_v21  ;;  %v4560_v21 = vld [vmem:[#allocation6 + $0x128] sm:$0xff] }
  0x88   :  { %6136 = vst [vmem:[#allocation25_spill] sm:$0xff] %v4488_v59  ;;  %v4518_v0 = vsub.f32 %v4465_v15, %v6141_v34  ;;  %v3261_v45 = vpack.c.bf16 %v1026_v19, %v1014_v42  ;;  %v1020_v41 = vand.u32 4294901760, %v1019_v12  ;;  %v6145_v63 = vand.u32 4294901760, %v4488_v59  ;;  %v4539_v19 = vld [vmem:[#allocation6 + $0x110] sm:$0xff]  ;;  %3182 = vmatprep.subr.bf16.mxu0 %v4341_v53 }
  0x89   :  { %6140 = vst [vmem:[#allocation27_spill] sm:$0xff] %v4512_v9  ;;  %v4523_v36 = vsub.f32 %v4467_v49, %v6143_v47  ;;  %v1049_v34 = vsub.f32 %v4494_v28, %v5876_v7  ;;  %v5883_v57 = vand.u32 4294901760, %v4525_v22 }
  0x8a   :  { %6142 = vst [vmem:[#allocation28_spill] sm:$0xff] %v4518_v0  ;;  %v1037_v11 = vsub.f32 %v4488_v59, %v6145_v63  ;;  %3262 = vmatprep.subr.bf16.mxu1 %v3261_v45  ;;  %v3263_v42 = vpack.c.bf16 %v1032_v32, %v1020_v41  ;;  %v6147_v63 = vand.u32 4294901760, %v4300_v6  ;;  %v6149_v17 = vand.u32 4294901760, %v4518_v0 }
  0x8b   :  { %6144 = vst [vmem:[#allocation29_spill] sm:$0xff] %v4523_v36  ;;  %v1050_v47 = vand.u32 4294901760, %v1049_v34  ;;  %v6150_v28 = vand.u32 4294901760, %v4523_v36  ;;  %v6151_v32 = vand.u32 4294901760, %v4506_v51  ;;  %v6153_v6 = vand.u32 4294901760, %v4333_v1  ;;  %3184 = vmatpush1.bf16.msra.mxu0 %v4397_v18 }
  0x8c   :  { %v1038_v12 = vand.u32 4294901760, %v1037_v11  ;;  %v4546_v7 = vpack.c.bf16 %v6147_v63, %v6146_v39  ;;  %v1043_v26 = vsub.f32 %v4518_v0, %v6149_v17  ;;  %3264 = vmatpush1.bf16.msra.mxu1 %v3263_v42  ;;  %v6154_v41 = vand.u32 4294901760, %v4335_v2  ;;  %v4575_v39 = vld [vmem:[#allocation6 + $0x138] sm:$0xff]  ;;  %3186 = vmatprep.subr.bf16.mxu0 %v4419_v37 }
  0x8d   :  { %v1055_v53 = vsub.f32 %v4523_v36, %v6150_v28  ;;  %v4558_v45 = vsub.f32 %v4506_v51, %v6151_v32  ;;  %v4571_v17 = vsub.f32 %v4525_v22, %v5883_v57  ;;  %v5884_v28 = vand.u32 4294901760, %v4537_v44 }
  0x8e   :  { %6148 = vst [vmem:[#allocation30_spill] sm:$0xff] %v4546_v7  ;;  %v4566_v11 = vpack.c.bf16 %v6154_v41, %v6153_v6  ;;  %v5887_v34 = vand.u32 4294901760, %v4539_v19  ;;  %v3265_v42 = vpack.c.bf16 %v1050_v47, %v1038_v12  ;;  %v1044_v63 = vand.u32 4294901760, %v1043_v26  ;;  %v4592_v26 = vld [vmem:[#allocation6 + $0x120] sm:$0xff] }
  0x8f   :  { %6152 = vst [vmem:[#allocation31_spill] sm:$0xff] %v4558_v45  ;;  %6156 = vst [vmem:[#allocation33_spill] sm:$0xff] %v4571_v17  ;;  %v1056_v1 = vand.u32 4294901760, %v1055_v53  ;;  %v5892_v2 = vand.u32 4294901760, %v4558_v45  ;;  %v4584_v6 = vsub.f32 %v4537_v44, %v5884_v28  ;;  %v4594_v53 = vld [vmem:[#allocation6 + $0x130] sm:$0xff]  ;;  %v6159_v28 = vand.u32 4294901760, %v4375_v23  ;;  %3188 = vmatpush1.bf16.msra.mxu0 %v4449_v14 }
  0x90   :  { %6155 = vst [vmem:[#allocation32_spill] sm:$0xff] %v4566_v11  ;;  %v4589_v41 = vsub.f32 %v4539_v19, %v5887_v34  ;;  %3266 = vmatprep.subr.bf16.mxu1 %v3265_v42  ;;  %v6160_v32 = vand.u32 4294901760, %v4390_v61  ;;  %v5893_v34 = vand.u32 4294901760, %v4575_v39  ;;  %v6162_v47 = vand.u32 4294901760, %v4571_v17  ;;  %3190 = vmatprep.subr.bf16.mxu0 %v4476_v56 }
  0x91   :  { %6157 = vst [vmem:[#allocation34_spill] sm:$0xff] %v4584_v6  ;;  %v3267_v12 = vpack.c.bf16 %v1056_v1, %v1044_v63  ;;  %v1061_v57 = vsub.f32 %v4558_v45, %v5892_v2  ;;  %v5896_v36 = vand.u32 4294901760, %v4584_v6  ;;  %v6163_v63 = vand.u32 4294901760, %v4560_v21  ;;  %v4632_v2 = vld [vmem:[#allocation6 + $0x148] sm:$0xff]  ;;  %v4663_v45 = vld [vmem:[#allocation6 + $0x140] sm:$0xff] }
  0x92   :  { %6158 = vst [vmem:[#allocation35_spill] sm:$0xff] %v4589_v41  ;;  %v4603_v37 = vpack.c.bf16 %v6160_v32, %v6159_v28  ;;  %v1073_v18 = vsub.f32 %v4571_v17, %v6162_v47  ;;  %v5899_v42 = vand.u32 4294901760, %v4589_v41  ;;  %v4620_v61 = vsub.f32 %v4575_v39, %v5893_v34 }
  0x93   :  { %v4614_v1 = vsub.f32 %v4560_v21, %v6163_v63  ;;  %3268 = vmatpush1.bf16.msra.mxu1 %v3267_v12  ;;  %v1062_v23 = vand.u32 4294901760, %v1061_v57  ;;  %v1067_v63 = vsub.f32 %v4584_v6, %v5896_v36  ;;  %v6166_v34 = vand.u32 4294901760, %v4410_v33  ;;  %v4651_v12 = vld [vmem:[#allocation6 + $0x158] sm:$0xff]  ;;  %3192 = vmatpush1.bf16.msra.mxu0 %v4512_v9 }
  0x94   :  { %6161 = vst [vmem:[#allocation36_spill] sm:$0xff] %v4603_v37  ;;  %6165 = vst [vmem:[#allocation38_spill] sm:$0xff] %v4620_v61  ;;  %v1074_v47 = vand.u32 4294901760, %v1073_v18  ;;  %v1079_v57 = vsub.f32 %v4589_v41, %v5899_v42  ;;  %v6167_v28 = vand.u32 4294901760, %v4412_v27  ;;  %v5908_v18 = vand.u32 4294901760, %v4620_v61  ;;  %3194 = vmatprep.subr.bf16.mxu0 %v4546_v7 }
  0x95   :  { %6164 = vst [vmem:[#allocation37_spill] sm:$0xff] %v4614_v1  ;;  %v6169_v56 = vand.u32 4294901760, %v4592_v26  ;;  %v6171_v14 = vand.u32 4294901760, %v4594_v53  ;;  %v1068_v33 = vand.u32 4294901760, %v1067_v63  ;;  %v6173_v27 = vand.u32 4294901760, %v4614_v1 }
  0x96   :  { %v4638_v32 = vpack.c.bf16 %v6167_v28, %v6166_v34  ;;  %v3269_v41 = vpack.c.bf16 %v1074_v47, %v1062_v23  ;;  %v1080_v6 = vand.u32 4294901760, %v1079_v57  ;;  %v4665_v23 = vld [vmem:[#allocation6 + $0x150] sm:$0xff]  ;;  %v6174_v57 = vand.u32 4294901760, %v4433_v5  ;;  %v4686_v5 = vld [vmem:[#allocation6 + $0x168] sm:$0xff] }
  0x97   :  { %v4644_v36 = vsub.f32 %v4592_v26, %v6169_v56  ;;  %v4649_v42 = vsub.f32 %v4594_v53, %v6171_v14  ;;  %v1085_v34 = vsub.f32 %v4614_v1, %v6173_v27  ;;  %v1097_v56 = vsub.f32 %v4620_v61, %v5908_v18  ;;  %3196 = vmatpush1.bf16.msra.mxu0 %v4566_v11 }
  0x98   :  { %6168 = vst [vmem:[#allocation39_spill] sm:$0xff] %v4638_v32  ;;  %3270 = vmatprep.subr.bf16.mxu1 %v3269_v41  ;;  %v3271_v47 = vpack.c.bf16 %v1080_v6, %v1068_v33  ;;  %v6175_v27 = vand.u32 4294901760, %v4442_v20  ;;  %v5915_v28 = vand.u32 4294901760, %v4651_v12  ;;  %v6179_v6 = vand.u32 4294901760, %v4632_v2  ;;  %3198 = vmatprep.subr.bf16.mxu0 %v4603_v37 }
  0x99   :  { %6170 = vst [vmem:[#allocation40_spill] sm:$0xff] %v4644_v36  ;;  %6172 = vst [vmem:[#allocation41_spill] sm:$0xff] %v4649_v42  ;;  %v1086_v63 = vand.u32 4294901760, %v1085_v34  ;;  %v1098_v14 = vand.u32 4294901760, %v1097_v56  ;;  %v6177_v17 = vand.u32 4294901760, %v4644_v36  ;;  %v6178_v61 = vand.u32 4294901760, %v4649_v42 }
  0x9a   :  { %v4672_v18 = vpack.c.bf16 %v6175_v27, %v6174_v57  ;;  %v4684_v41 = vsub.f32 %v4632_v2, %v6179_v6  ;;  %3272 = vmatpush1.bf16.msra.mxu1 %v3271_v47  ;;  %v6181_v20 = vand.u32 4294901760, %v4465_v15  ;;  %v6182_v33 = vand.u32 4294901760, %v4467_v49  ;;  %v4701_v57 = vld [vmem:[#allocation6 + $0x178] sm:$0xff] }
  0x9b   :  { %v1091_v9 = vsub.f32 %v4644_v36, %v6177_v17  ;;  %v1103_v7 = vsub.f32 %v4649_v42, %v6178_v61  ;;  %v4697_v17 = vsub.f32 %v4651_v12, %v5915_v28  ;;  %v5916_v61 = vand.u32 4294901760, %v4663_v45  ;;  %3200 = vmatpush1.bf16.msra.mxu0 %v4638_v32 }
  0x9c   :  { %6176 = vst [vmem:[#allocation42_spill] sm:$0xff] %v4672_v18  ;;  %6180 = vst [vmem:[#allocation43_spill] sm:$0xff] %v4684_v41  ;;  %v4692_v34 = vpack.c.bf16 %v6182_v33, %v6181_v20  ;;  %v5919_v56 = vand.u32 4294901760, %v4665_v23  ;;  %v3273_v47 = vpack.c.bf16 %v1098_v14, %v1086_v63  ;;  %v5924_v49 = vand.u32 4294901760, %v4684_v41  ;;  %3202 = vmatprep.subr.bf16.mxu0 %v4672_v18 }
  0x9d   :  { %6184 = vst [vmem:[#allocation45_spill] sm:$0xff] %v4697_v17  ;;  %v1092_v27 = vand.u32 4294901760, %v1091_v9  ;;  %v1104_v15 = vand.u32 4294901760, %v1103_v7  ;;  %v4710_v20 = vsub.f32 %v4663_v45, %v5916_v61  ;;  %v4718_v9 = vld [vmem:[#allocation6 + $0x160] sm:$0xff]  ;;  %v4720_v7 = vld [vmem:[#allocation6 + $0x170] sm:$0xff]  ;;  %v6187_v61 = vand.u32 4294901760, %v4506_v51 }
  0x9e   :  { %6183 = vst [vmem:[#allocation44_spill] sm:$0xff] %v4692_v34  ;;  %v4715_v33 = vsub.f32 %v4665_v23, %v5919_v56  ;;  %3274 = vmatprep.subr.bf16.mxu1 %v3273_v47  ;;  %v1109_v28 = vsub.f32 %v4684_v41, %v5924_v49  ;;  %v6188_v6 = vand.u32 4294901760, %v4525_v22  ;;  %v5925_v56 = vand.u32 4294901760, %v4701_v57  ;;  %v4900_v41 = vld [vmem:[#allocation6 + $0x1c0] sm:$0xff] }
  0x9f   :  { %6185 = vst [vmem:[#allocation46_spill] sm:$0xff] %v4710_v20  ;;  %v3275_v63 = vpack.c.bf16 %v1104_v15, %v1092_v27  ;;  %v6190_v14 = vand.u32 4294901760, %v4697_v17  ;;  %v5928_v42 = vand.u32 4294901760, %v4710_v20  ;;  %v6191_v27 = vand.u32 4294901760, %v4686_v5  ;;  %3204 = vmatpush1.bf16.msra.mxu0 %v4692_v34 }
  0xa0   :  { %6186 = vst [vmem:[#allocation47_spill] sm:$0xff] %v4715_v33  ;;  %v4729_v37 = vpack.c.bf16 %v6188_v6, %v6187_v61  ;;  %v5931_v47 = vand.u32 4294901760, %v4715_v33  ;;  %v1110_v51 = vand.u32 4294901760, %v1109_v28  ;;  %v4746_v22 = vsub.f32 %v4701_v57, %v5925_v56 }
  0xa1   :  { %v1121_v11 = vsub.f32 %v4697_v17, %v6190_v14  ;;  %v4740_v15 = vsub.f32 %v4686_v5, %v6191_v27  ;;  %3276 = vmatpush1.bf16.msra.mxu1 %v3275_v63  ;;  %v5934_v61 = vand.u32 4294901760, %v4718_v9  ;;  %v5937_v6 = vand.u32 4294901760, %v4720_v7  ;;  %v4898_v17 = vld [vmem:[#allocation6 + $0x1d8] sm:$0xff] }
  0xa2   :  { %6189 = vst [vmem:[#allocation48_spill] sm:$0xff] %v4729_v37  ;;  %6193 = vst [vmem:[#allocation50_spill] sm:$0xff] %v4746_v22  ;;  %v1115_v27 = vsub.f32 %v4710_v20, %v5928_v42  ;;  %v1127_v28 = vsub.f32 %v4715_v33, %v5931_v47  ;;  %v6196_v49 = vand.u32 4294901760, %v4537_v44  ;;  %v6197_v33 = vand.u32 4294901760, %v4539_v19  ;;  %3206 = vmatprep.subr.bf16.mxu0 %v4729_v37 }
  0xa3   :  { %6192 = vst [vmem:[#allocation49_spill] sm:$0xff] %v4740_v15  ;;  %v1122_v14 = vand.u32 4294901760, %v1121_v11  ;;  %v5938_v63 = vand.u32 4294901760, %v4740_v15  ;;  %v4762_v56 = vsub.f32 %v4718_v9, %v5934_v61  ;;  %v4767_v11 = vsub.f32 %v4720_v7, %v5937_v6 }
  0xa4   :  { %v1116_v42 = vand.u32 4294901760, %v1115_v27  ;;  %v1128_v32 = vand.u32 4294901760, %v1127_v28  ;;  %v4777_v61 = vpack.c.bf16 %v6197_v33, %v6196_v49  ;;  %v6199_v20 = vand.u32 4294901760, %v4746_v22 }
  0xa5   :  { %6194 = vst [vmem:[#allocation51_spill] sm:$0xff] %v4762_v56  ;;  %6195 = vst [vmem:[#allocation52_spill] sm:$0xff] %v4767_v11  ;;  %v3277_v18 = vpack.c.bf16 %v1122_v14, %v1110_v51  ;;  %v1133_v47 = vsub.f32 %v4740_v15, %v5938_v63  ;;  %v5940_v51 = vand.u32 4294901760, %v4762_v56  ;;  %v5939_v14 = vand.u32 4294901760, %v4767_v11 }
  0xa6   :  { %6198 = vst [vmem:[#allocation53_spill] sm:$0xff] %v4777_v61  ;;  %v1145_v6 = vsub.f32 %v4746_v22, %v6199_v20  ;;  %v3279_v27 = vpack.c.bf16 %v1128_v32, %v1116_v42  ;;  %v6200_v63 = vand.u32 4294901760, %v4560_v21  ;;  %v6201_v44 = vand.u32 4294901760, %v4575_v39  ;;  %3208 = vmatpush1.bf16.msra.mxu0 %v4777_v61 }
  0xa7   :  { %3278 = vmatprep.subr.bf16.mxu1 %v3277_v18  ;;  %v1134_v28 = vand.u32 4294901760, %v1133_v47  ;;  %v1139_v20 = vsub.f32 %v4762_v56, %v5940_v51  ;;  %v1151_v33 = vsub.f32 %v4767_v11, %v5939_v14  ;;  %v6203_v21 = vand.u32 4294901760, %v4592_v26  ;;  %v4812_v26 = vld [vmem:[#allocation6 + $0x180] sm:$0xff] }
  0xa8   :  { %v4789_v19 = vpack.c.bf16 %v6201_v44, %v6200_v63  ;;  %v1146_v49 = vand.u32 4294901760, %v1145_v6  ;;  %3280 = vmatpush1.bf16.msra.mxu1 %v3279_v27  ;;  %v6204_v39 = vand.u32 4294901760, %v4594_v53  ;;  %v4806_v63 = vld [vmem:[#allocation6 + $0x188] sm:$0xff]  ;;  %v4808_v27 = vld [vmem:[#allocation6 + $0x198] sm:$0xff]  ;;  %v4814_v53 = vld [vmem:[#allocation6 + $0x190] sm:$0xff] }
  0xa9   :  { %v1140_v32 = vand.u32 4294901760, %v1139_v20  ;;  %v1152_v18 = vand.u32 4294901760, %v1151_v33  ;;  %v5941_v44 = vand.u32 4294901760, %v4808_v27  ;;  %v5946_v20 = vand.u32 4294901760, %v4814_v53 }
  0xaa   :  { %6202 = vst [vmem:[#allocation54_spill] sm:$0xff] %v4789_v19  ;;  %v3281_v42 = vpack.c.bf16 %v1146_v49, %v1134_v28  ;;  %v4802_v47 = vpack.c.bf16 %v6204_v39, %v6203_v21  ;;  %3210 = vmatprep.subr.bf16.mxu0 %v4789_v19  ;;  %v5942_v28 = vand.u32 4294901760, %v4806_v63  ;;  %v5943_v49 = vand.u32 4294901760, %v4812_v26  ;;  %v4838_v21 = vld [vmem:[#allocation6 + $0x1a8] sm:$0xff]  ;;  %v4840_v39 = vld [vmem:[#allocation6 + $0x1b8] sm:$0xff] }
  0xab   :  { %v3283_v6 = vpack.c.bf16 %v1152_v18, %v1140_v32  ;;  %v4836_v18 = vsub.f32 %v4814_v53, %v5946_v20  ;;  %v6211_v37 = vand.u32 4294901760, %v4838_v21 }
  0xac   :  { %6205 = vst [vmem:[#allocation55_spill] sm:$0xff] %v4802_v47  ;;  %3282 = vmatprep.subr.bf16.mxu1 %v3281_v42  ;;  %3212 = vmatpush1.bf16.msra.mxu0 %v4802_v47  ;;  %v4821_v33 = vsub.f32 %v4806_v63, %v5942_v28  ;;  %v4826_v42 = vsub.f32 %v4808_v27, %v5941_v44  ;;  %v4846_v28 = vld [vmem:[#allocation6 + $0x1a0] sm:$0xff]  ;;  %v6213_v47 = vand.u32 4294901760, %v4840_v39 }
  0xad   :  { %3284 = vmatpush1.bf16.msra.mxu1 %v3283_v6  ;;  %v4831_v32 = vsub.f32 %v4812_v26, %v5943_v49  ;;  %6209 = vst [vmem:[#allocation59_spill] sm:$0xff] %v4836_v18  ;;  %v4848_v49 = vld [vmem:[#allocation6 + $0x1b0] sm:$0xff]  ;;  %v4863_v34 = vsub.f32 %v4838_v21, %v6211_v37 }
  0xae   :  { %6206 = vst [vmem:[#allocation56_spill] sm:$0xff] %v4821_v33  ;;  %6207 = vst [vmem:[#allocation57_spill] sm:$0xff] %v4826_v42  ;;  %v5955_v6 = vand.u32 4294901760, %v4821_v33  ;;  %v6210_v51 = vand.u32 4294901760, %v4826_v42  ;;  %v4868_v20 = vsub.f32 %v4840_v39, %v6213_v47  ;;  %v6218_v37 = vand.u32 4294901760, %v4848_v49 }
  0xaf   :  { %6208 = vst [vmem:[#allocation58_spill] sm:$0xff] %v4831_v32  ;;  %6212 = vst [vmem:[#allocation60_spill] sm:$0xff] %v4863_v34  ;;  %v6215_v61 = vand.u32 4294901760, %v4831_v32  ;;  %v5976_v22 = vand.u32 4294901760, %v4863_v34 }
  0xb0   :  { %v1157_v14 = vsub.f32 %v4821_v33, %v5955_v6  ;;  %v1169_v44 = vsub.f32 %v4826_v42, %v6210_v51  ;;  %6214 = vst [vmem:[#allocation61_spill] sm:$0xff] %v4868_v20  ;;  %v6216_v6 = vand.u32 4294901760, %v4836_v18  ;;  %v6217_v51 = vand.u32 4294901760, %v4846_v28 }
  0xb1   :  { %v1163_v19 = vsub.f32 %v4831_v32, %v6215_v61  ;;  %v4884_v11 = vsub.f32 %v4848_v49, %v6218_v37  ;;  %v5977_v61 = vand.u32 4294901760, %v4868_v20 }
  0xb2   :  { %v1175_v33 = vsub.f32 %v4836_v18, %v6216_v6  ;;  %v4879_v42 = vsub.f32 %v4846_v28, %v6217_v51  ;;  %v1158_v47 = vand.u32 4294901760, %v1157_v14  ;;  %v1170_v56 = vand.u32 4294901760, %v1169_v44  ;;  %v4896_v44 = vld [vmem:[#allocation6 + $0x1c8] sm:$0xff] }
  0xb3   :  { %v1164_v32 = vand.u32 4294901760, %v1163_v19  ;;  %v1181_v51 = vsub.f32 %v4863_v34, %v5976_v22  ;;  %v1193_v37 = vsub.f32 %v4868_v20, %v5977_v61  ;;  %v6219_v19 = vand.u32 4294901760, %v4632_v2  ;;  %v4911_v61 = vld [vmem:[#allocation6 + $0x1d0] sm:$0xff]  ;;  %v4913_v14 = vld [vmem:[#allocation6 + $0x1e8] sm:$0xff] }
  0xb4   :  { %v1176_v15 = vand.u32 4294901760, %v1175_v33  ;;  %v5984_v6 = vand.u32 4294901760, %v4879_v42  ;;  %v3285_v18 = vpack.c.bf16 %v1170_v56, %v1158_v47  ;;  %v6220_v56 = vand.u32 4294901760, %v4651_v12 }
  0xb5   :  { %v6222_v20 = vand.u32 4294901760, %v4663_v45  ;;  %v6223_v34 = vand.u32 4294901760, %v4665_v23  ;;  %v1182_v2 = vand.u32 4294901760, %v1181_v51  ;;  %v1194_v12 = vand.u32 4294901760, %v1193_v37  ;;  %v4930_v51 = vld [vmem:[#allocation6 + $0x1f8] sm:$0xff] }
  0xb6   :  { %v4906_v33 = vpack.c.bf16 %v6220_v56, %v6219_v19  ;;  %v3287_v47 = vpack.c.bf16 %v1176_v15, %v1164_v32  ;;  %v1187_v22 = vsub.f32 %v4879_v42, %v5984_v6  ;;  %3286 = vmatprep.subr.bf16.mxu1 %v3285_v18  ;;  %v6225_v19 = vand.u32 4294901760, %v4884_v11 }
  0xb7   :  { %v4919_v36 = vpack.c.bf16 %v6223_v34, %v6222_v20  ;;  %v5986_v56 = vand.u32 4294901760, %v4896_v44  ;;  %v3289_v23 = vpack.c.bf16 %v1194_v12, %v1182_v2  ;;  %v5985_v20 = vand.u32 4294901760, %v4911_v61 }
  0xb8   :  { %6221 = vst [vmem:[#allocation62_spill] sm:$0xff] %v4906_v33  ;;  %v1199_v15 = vsub.f32 %v4884_v11, %v6225_v19  ;;  %3214 = vmatprep.subr.bf16.mxu0 %v4906_v33  ;;  %3288 = vmatpush1.bf16.msra.mxu1 %v3287_v47  ;;  %v1188_v32 = vand.u32 4294901760, %v1187_v22  ;;  %v5987_v37 = vand.u32 4294901760, %v4913_v14  ;;  %v6226_v19 = vand.u32 4294901760, %v4686_v5 }
  0xb9   :  { %6224 = vst [vmem:[#allocation63_spill] sm:$0xff] %v4919_v36  ;;  %3216 = vmatpush1.bf16.msra.mxu0 %v4919_v36  ;;  %v6227_v22 = vand.u32 4294901760, %v4701_v57  ;;  %v6229_v6 = vand.u32 4294901760, %v4718_v9  ;;  %v6230_v45 = vand.u32 4294901760, %v4720_v7  ;;  %v4948_v2 = vsub.f32 %v4896_v44, %v5986_v56  ;;  %3290 = vmatprep.subr.bf16.mxu1 %v3289_v23 }
  0xba   :  { %v1200_v34 = vand.u32 4294901760, %v1199_v15  ;;  %v6232_v12 = vand.u32 4294901760, %v4898_v17  ;;  %v6233_v57 = vand.u32 4294901760, %v4806_v63  ;;  %v6234_v9 = vand.u32 4294901760, %v4808_v27 }
  0xbb   :  { %v4937_v47 = vpack.c.bf16 %v6227_v22, %v6226_v19  ;;  %v4943_v18 = vpack.c.bf16 %v6230_v45, %v6229_v6  ;;  %v6236_v7 = vand.u32 4294901760, %v4900_v41  ;;  %v4969_v45 = vsub.f32 %v4911_v61, %v5985_v20  ;;  %v706_v22 = vld [vmem:[#allocation6 + $0x1e0] sm:$0xff] }
  0xbc   :  { %v4953_v15 = vsub.f32 %v4898_v17, %v6232_v12  ;;  %v3291_v5 = vpack.c.bf16 %v1200_v34, %v1188_v32  ;;  %v4959_v19 = vpack.c.bf16 %v6234_v9, %v6233_v57  ;;  %v5988_v32 = vand.u32 4294901760, %v4948_v2  ;;  %v708_v57 = vld [vmem:[#allocation6 + $0x1f0] sm:$0xff] }
  0xbd   :  { %6228 = vst [vmem:[#allocation64_spill] sm:$0xff] %v4937_v47  ;;  %6231 = vst [vmem:[#allocation65_spill] sm:$0xff] %v4943_v18  ;;  %v4964_v6 = vsub.f32 %v4900_v41, %v6236_v7  ;;  %3218 = vmatprep.subr.bf16.mxu0 %v4937_v47  ;;  %v6238_v27 = vand.u32 4294901760, %v4812_v26  ;;  %v6239_v23 = vand.u32 4294901760, %v4814_v53  ;;  %v845_v12 = vand.u32 4294901760, %v4930_v51 }
  0xbe   :  { %6235 = vst [vmem:[#allocation66_spill] sm:$0xff] %v4959_v19  ;;  %6237 = vst [vmem:[#allocation67_spill] sm:$0xff] %v4969_v45  ;;  %v5991_v63 = vand.u32 4294901760, %v4953_v15  ;;  %3292 = vmatpush1.bf16.msra.mxu1 %v3291_v5  ;;  %3220 = vmatpush1.bf16.msra.mxu0 %v4943_v18  ;;  %v5999_v7 = vand.u32 4294901760, %v4969_v45  ;;  %v4987_v20 = vsub.f32 %v4913_v14, %v5987_v37  ;;  %v6241_v26 = vand.u32 4294901760, %v4838_v21 }
  0xbf   :  { %v4978_v34 = vpack.c.bf16 %v6239_v23, %v6238_v27  ;;  %v5996_v9 = vand.u32 4294901760, %v4964_v6  ;;  %v6242_v53 = vand.u32 4294901760, %v4840_v39  ;;  %v1205_v5 = vsub.f32 %v4948_v2, %v5988_v32  ;;  %3222 = vmatprep.subr.bf16.mxu0 %v4959_v19 }
  0xc0   :  { %v1217_v23 = vsub.f32 %v4953_v15, %v5991_v63  ;;  %v5003_v56 = vsub.f32 %v4930_v51, %v845_v12  ;;  %v843_v37 = vand.u32 4294901760, %v706_v22  ;;  %v1223_v39 = vsub.f32 %v4969_v45, %v5999_v7 }
  0xc1   :  { %6240 = vst [vmem:[#allocation68_spill] sm:$0xff] %v4978_v34  ;;  %v4993_v27 = vpack.c.bf16 %v6242_v53, %v6241_v26  ;;  %v1211_v21 = vsub.f32 %v4964_v6, %v5996_v9  ;;  %v6009_v26 = vand.u32 4294901760, %v4987_v20  ;;  %v847_v53 = vand.u32 4294901760, %v708_v57 }
  0xc2   :  { %6244 = vst [vmem:[#allocation70_spill] sm:$0xff] %v5003_v56  ;;  %v1206_v32 = vand.u32 4294901760, %v1205_v5  ;;  %v1218_v18 = vand.u32 4294901760, %v1217_v23  ;;  %v6004_v63 = vand.u32 4294901760, %v5003_v56  ;;  %v5013_v19 = vsub.f32 %v706_v22, %v843_v37  ;;  %3224 = vmatpush1.bf16.msra.mxu0 %v4978_v34 }
  0xc3   :  { %6243 = vst [vmem:[#allocation69_spill] sm:$0xff] %v4993_v27  ;;  %v1212_v51 = vand.u32 4294901760, %v1211_v21  ;;  %v1224_v47 = vand.u32 4294901760, %v1223_v39  ;;  %v1229_v9 = vsub.f32 %v4987_v20, %v6009_v26  ;;  %v5019_v36 = vsub.f32 %v708_v57, %v847_v53  ;;  %3226 = vmatprep.subr.bf16.mxu0 %v4993_v27 }
  0xc4   :  { %v3293_v7 = vpack.c.bf16 %v1218_v18, %v1206_v32  ;;  %v1241_v5 = vsub.f32 %v5003_v56, %v6004_v63  ;;  %v6008_v22 = vand.u32 4294901760, %v5013_v19  ;;  %v6246_v23 = vand.u32 4294901760, %v4846_v28 }
  0xc5   :  { %6245 = vst [vmem:[#allocation71_spill] sm:$0xff] %v5019_v36  ;;  %v6247_v21 = vand.u32 4294901760, %v4848_v49  ;;  %v3295_v34 = vpack.c.bf16 %v1224_v47, %v1212_v51  ;;  %v1230_v33 = vand.u32 4294901760, %v1229_v9  ;;  %v6007_v57 = vand.u32 4294901760, %v5019_v36 }
  0xc6   :  { %3294 = vmatprep.subr.bf16.mxu1 %v3293_v7  ;;  %v1242_v18 = vand.u32 4294901760, %v1241_v5  ;;  %v1235_v32 = vsub.f32 %v5013_v19, %v6008_v22  ;;  %v6249_v47 = vand.u32 4294901760, %v4896_v44  ;;  %v6250_v9 = vand.u32 4294901760, %v4898_v17 }
  0xc7   :  { %v5030_v39 = vpack.c.bf16 %v6247_v21, %v6246_v23  ;;  %3296 = vmatpush1.bf16.msra.mxu1 %v3295_v34  ;;  %v1247_v63 = vsub.f32 %v5019_v36, %v6007_v57  ;;  %v3301_v5 = vpack.c.bf16 %v4084_v29, %v4077_v25  ;;  %v6252_v34 = vand.u32 4294901760, %v4900_v41  ;;  %v6269_v41 = vld [vmem:[#allocation35_spill] sm:$0xff] }
  0xc8   :  { %v3297_v28 = vpack.c.bf16 %v1242_v18, %v1230_v33  ;;  %v1236_v49 = vand.u32 4294901760, %v1235_v32  ;;  %v5044_v51 = vpack.c.bf16 %v6250_v9, %v6249_v47  ;;  %v6253_v23 = vand.u32 4294901760, %v4911_v61 }
  0xc9   :  { %6248 = vst [vmem:[#allocation72_spill] sm:$0xff] %v5030_v39  ;;  %3228 = vmatpush1.bf16.msra.mxu0 %v5030_v39  ;;  %v1248_v7 = vand.u32 4294901760, %v1247_v63  ;;  %v6255_v17 = vand.u32 4294901760, %v4913_v14  ;;  %v5061_v63 = vpack.c.bf16 %v847_v53, %v843_v37  ;;  %v87_v61 = vlaneseq  ;;  %v74_v14 = vld [vmem:[%s5810_s4] ss:$4 sm:$0x3] }
  0xca   :  { %6251 = vst [vmem:[#allocation73_spill] sm:$0xff] %v5044_v51  ;;  %3298 = vmatprep.subr.bf16.mxu1 %v3297_v28  ;;  %3230 = vmatprep.subr.bf16.mxu0 %v5044_v51  ;;  %v5053_v21 = vpack.c.bf16 %v6253_v23, %v6252_v34 }
  0xcb   :  { %v3299_v33 = vpack.c.bf16 %v1248_v7, %v1236_v49  ;;  %v5058_v44 = vpack.c.bf16 %v845_v12, %v6255_v17  ;;  %6257 = vst [vmem:[#allocation76_spill] sm:$0xff] %v5061_v63  ;;  %v5066_v18 = vshrl.u32 %v87_v61, 7  ;;  %v3305_v17 = vpack.c.bf16 %v4105_v38, %v4099_v35 }
  0xcc   :  { %6254 = vst [vmem:[#allocation74_spill] sm:$0xff] %v5053_v21 }
  0xcd   :  { %3232 = vmatpush1.bf16.msra.mxu0 %v5053_v21  ;;  %6256 = vst [vmem:[#allocation75_spill] sm:$0xff] %v5058_v44  ;;  %3300 = vmatpush1.bf16.msra.mxu1 %v3299_v33  ;;  %6258 = vst [vmem:[#allocation77_spill] sm:$0xff] %v5066_v18  ;;  %v6006_v32 = vsub.s32 0, %v5066_v18  ;;  %v6005_v12 = vsub.s32 1, %v5066_v18  ;;  %v3303_v33 = vpack.c.bf16 %v4094_v31, %v4089_v30 }
  0xce   :  { %3302 = vmatprep.subr.bf16.mxu1 %v3301_v5  ;;  %3234 = vmatprep.subr.bf16.mxu0 %v5058_v44 }
  0xcf   :  { %v90_v37 = vrot.slane %v74_v14, %v6006_v32  ;;  %v94_v53 = vrot.slane %v74_v14, %v6005_v12  ;;  %v3315_v12 = vpack.c.bf16 %v4260_v58, %v4249_v46  ;;  %v3317_v32 = vpack.c.bf16 %v4312_v8, %v4307_v3 }
  0xd1   :  { %3236 = vmatpush1.bf16.msra.mxu0 %v5061_v63 }
 0x155   :  { %v639_v28 = vpop.f32.mrb[0].mxu0 }
 0x156   :  { %v3749_v49 = vadd.f32 %v639_v28, %v90_v37  ;;  %v641_v47 = vpop.f32.mrb[1].mxu0 }
 0x157   :  { %v3750_v9 = vadd.f32 %v641_v47, %v94_v53  ;;  %v3307_v53 = vpack.c.bf16 %v4125_v52, %v4111_v40 }
 0x158   :  { %3782 = vtanh.f32 %v3749_v49  ;;  %v3309_v49 = vpack.c.bf16 %v4189_v24, %v4174_v4 }
 0x159   :  { %3784 = vtanh.f32 %v3750_v9 }
 0x162   :  { %v3783_v7 = vpop.eup %3782 }
 0x163   :  { %v3785_v5 = vpop.eup %3784  ;;  %v5077_v34 = vand.u32 4294901760, %v3783_v7 }
 0x164   :  { %v5079_v23 = vand.u32 4294901760, %v3785_v5 }
 0x165   :  { %6259 = vst [vmem:[#allocation78_spill] sm:$0xff] %v5077_v34  ;;  %v5086_v61 = vsub.f32 %v3783_v7, %v5077_v34 }
 0x166   :  { %1251 = vmatprep.mubr.f32.mxu1 %v5079_v23  ;;  %v5090_v14 = vsub.f32 %v3785_v5, %v5079_v23  ;;  %v3311_v5 = vpack.c.bf16 %v4215_v48, %v4200_v43 }
 0x167   :  { %1253 = vmatmul.mubr.f32.vlgmr.msra.gmra.mrb[0].mxu1 %v5077_v34  ;;  %v6010_v37 = vand.u32 4294901760, %v5086_v61 }
 0x168   :  { %3304 = vmatpush1.bf16.msra.mxu1 %v3303_v33  ;;  %1453 = vmatprep.mubr.f32.mxu1 %v5090_v14  ;;  %v6011_v28 = vand.u32 4294901760, %v5090_v14 }
 0x169   :  { %3306 = vmatprep.subr.bf16.mxu1 %v3305_v17  ;;  %v858_v47 = vsub.f32 %v5086_v61, %v6010_v37  ;;  %v3313_v17 = vpack.c.bf16 %v4230_v13, %v4220_v50  ;;  %v6267_v37 = vld [vmem:[#allocation33_spill] sm:$0xff] }
 0x16a   :  { %v852_v9 = vsub.f32 %v5090_v14, %v6011_v28 }
 0x16b   :  { %v859_v33 = vand.u32 4294901760, %v858_v47  ;;  %v3323_v47 = vpack.c.bf16 %v4388_v16, %v4383_v54 }
 0x16c   :  { %3308 = vmatpush1.bf16.msra.mxu1 %v3307_v53  ;;  %v853_v7 = vand.u32 4294901760, %v852_v9  ;;  %v3319_v53 = vpack.c.bf16 %v4347_v62, %v4326_v55  ;;  %v6260_v9 = vld [vmem:[#allocation19_spill] sm:$0xff] }
 0x16d   :  { %3310 = vmatprep.subr.bf16.mxu1 %v3309_v49  ;;  %v3321_v49 = vpack.c.bf16 %v4363_v10, %v4358_v60 }
 0x16e   :  { %854 = vmatprep.mubr.f32.mxu0 %v853_v7  ;;  %v6261_v7 = vld [vmem:[#allocation20_spill] sm:$0xff] }
 0x16f   :  { %860 = vmatmul.mubr.f32.vlgmr.msra.gmra.mrb[2].mxu0 %v859_v33  ;;  %v6262_v33 = vld [vmem:[#allocation22_spill] sm:$0xff] }
 0x170   :  { %3312 = vmatpush1.bf16.msra.mxu1 %v3311_v5  ;;  %v3325_v5 = vpack.c.bf16 %v6261_v7, %v6260_v9 }
 0x171   :  { %3314 = vmatprep.subr.bf16.mxu1 %v3313_v17  ;;  %v6263_v17 = vld [vmem:[#allocation23_spill] sm:$0xff] }
 0x172   :  { %v3327_v57 = vpack.c.bf16 %v6263_v17, %v6262_v33  ;;  %v6272_v17 = vld [vmem:[#allocation41_spill] sm:$0xff] }
 0x174   :  { %3316 = vmatpush1.bf16.msra.mxu1 %v3315_v12  ;;  %v6264_v12 = vld [vmem:[#allocation26_spill] sm:$0xff] }
 0x175   :  { %3318 = vmatprep.subr.bf16.mxu1 %v3317_v32  ;;  %v3329_v22 = vpack.c.bf16 %v6264_v12, %v4488_v59  ;;  %v6265_v32 = vld [vmem:[#allocation29_spill] sm:$0xff] }
 0x176   :  { %v3331_v26 = vpack.c.bf16 %v6265_v32, %v4518_v0  ;;  %v6274_v59 = vld [vmem:[#allocation45_spill] sm:$0xff]  ;;  %v6276_v0 = vld [vmem:[#allocation47_spill] sm:$0xff] }
 0x178   :  { %3320 = vmatpush1.bf16.msra.mxu1 %v3319_v53  ;;  %v6266_v53 = vld [vmem:[#allocation31_spill] sm:$0xff] }
 0x179   :  { %3322 = vmatprep.subr.bf16.mxu1 %v3321_v49  ;;  %v3333_v28 = vpack.c.bf16 %v6267_v37, %v6266_v53  ;;  %v6268_v49 = vld [vmem:[#allocation34_spill] sm:$0xff] }
 0x17a   :  { %v3335_v18 = vpack.c.bf16 %v6269_v41, %v6268_v49  ;;  %v6278_v53 = vld [vmem:[#allocation50_spill] sm:$0xff]  ;;  %v6280_v49 = vld [vmem:[#allocation52_spill] sm:$0xff] }
 0x17c   :  { %3324 = vmatpush1.bf16.msra.mxu1 %v3323_v47  ;;  %v6270_v47 = vld [vmem:[#allocation38_spill] sm:$0xff] }
 0x17d   :  { %3326 = vmatprep.subr.bf16.mxu1 %v3325_v5  ;;  %v3337_v34 = vpack.c.bf16 %v6270_v47, %v4614_v1  ;;  %v6271_v5 = vld [vmem:[#allocation40_spill] sm:$0xff]  ;;  %v6282_v1 = vld [vmem:[#allocation57_spill] sm:$0xff] }
 0x17e   :  { %v3339_v12 = vpack.c.bf16 %v6272_v17, %v6271_v5  ;;  %v6284_v5 = vld [vmem:[#allocation59_spill] sm:$0xff] }
 0x180   :  { %3328 = vmatpush1.bf16.msra.mxu1 %v3327_v57  ;;  %v6273_v57 = vld [vmem:[#allocation43_spill] sm:$0xff] }
 0x181   :  { %3330 = vmatprep.subr.bf16.mxu1 %v3329_v22  ;;  %v3341_v32 = vpack.c.bf16 %v6274_v59, %v6273_v57  ;;  %v6275_v22 = vld [vmem:[#allocation46_spill] sm:$0xff]  ;;  %v6286_v57 = vld [vmem:[#allocation61_spill] sm:$0xff] }
 0x182   :  { %v3343_v37 = vpack.c.bf16 %v6276_v0, %v6275_v22 }
 0x184   :  { %3332 = vmatpush1.bf16.msra.mxu1 %v3331_v26  ;;  %v6277_v26 = vld [vmem:[#allocation49_spill] sm:$0xff] }
 0x185   :  { %3334 = vmatprep.subr.bf16.mxu1 %v3333_v28  ;;  %v3345_v41 = vpack.c.bf16 %v6278_v53, %v6277_v26  ;;  %v6279_v28 = vld [vmem:[#allocation51_spill] sm:$0xff] }
 0x186   :  { %v3347_v47 = vpack.c.bf16 %v6280_v49, %v6279_v28 }
 0x188   :  { %3336 = vmatpush1.bf16.msra.mxu1 %v3335_v18  ;;  %v6281_v18 = vld [vmem:[#allocation56_spill] sm:$0xff] }
 0x189   :  { %3338 = vmatprep.subr.bf16.mxu1 %v3337_v34  ;;  %v3349_v17 = vpack.c.bf16 %v6282_v1, %v6281_v18  ;;  %v6283_v34 = vld [vmem:[#allocation58_spill] sm:$0xff] }
 0x18a   :  { %v3351_v59 = vpack.c.bf16 %v6284_v5, %v6283_v34 }
 0x18c   :  { %3340 = vmatpush1.bf16.msra.mxu1 %v3339_v12  ;;  %v6285_v12 = vld [vmem:[#allocation60_spill] sm:$0xff] }
 0x18d   :  { %3342 = vmatprep.subr.bf16.mxu1 %v3341_v32  ;;  %v3353_v0 = vpack.c.bf16 %v6286_v57, %v6285_v12  ;;  %v3355_v32 = vpack.c.bf16 %v4884_v11, %v4879_v42 }
 0x190   :  { %3344 = vmatpush1.bf16.msra.mxu1 %v3343_v37  ;;  %v3357_v37 = vpack.c.bf16 %v4953_v15, %v4948_v2 }
 0x191   :  { %3346 = vmatprep.subr.bf16.mxu1 %v3345_v41  ;;  %v3359_v41 = vpack.c.bf16 %v4969_v45, %v4964_v6  ;;  %v6291_v45 = vld [vmem:[#allocation14_spill] sm:$0xff] }
 0x194   :  { %3348 = vmatpush1.bf16.msra.mxu1 %v3347_v47  ;;  %v3361_v47 = vpack.c.bf16 %v5003_v56, %v4987_v20  ;;  %v6293_v56 = vld [vmem:[#allocation16_spill] sm:$0xff] }
 0x195   :  { %3350 = vmatprep.subr.bf16.mxu1 %v3349_v17  ;;  %v6288_v17 = vld [vmem:[#allocation12_spill] sm:$0xff] }
 0x198   :  { %3352 = vmatpush1.bf16.msra.mxu1 %v3351_v59  ;;  %v6287_v59 = vpack.c.bf16 %v5019_v36, %v5013_v19  ;;  %v6298_v36 = vld [vmem:[#allocation27_spill] sm:$0xff] }
 0x199   :  { %3354 = vmatprep.subr.bf16.mxu1 %v3353_v0  ;;  %v6289_v0 = vld [vmem:[#allocation13_spill] sm:$0xff] }
 0x19c   :  { %3356 = vmatpush1.bf16.msra.mxu1 %v3355_v32  ;;  %v6290_v32 = vand.u32 4294901760, %v5090_v14  ;;  %v6300_v14 = vld [vmem:[#allocation32_spill] sm:$0xff] }
 0x19d   :  { %3358 = vmatprep.subr.bf16.mxu1 %v3357_v37  ;;  %v6292_v37 = vld [vmem:[#allocation15_spill] sm:$0xff] }
 0x1a0   :  { %3360 = vmatpush1.bf16.msra.mxu1 %v3359_v41  ;;  %v6294_v41 = vld [vmem:[#allocation17_spill] sm:$0xff] }
 0x1a1   :  { %3362 = vmatprep.subr.bf16.mxu1 %v3361_v47  ;;  %v6295_v47 = vld [vmem:[#allocation18_spill] sm:$0xff] }
 0x1a4   :  { %3364 = vmatpush1.bf16.msra.mxu1 %v6287_v59  ;;  %v6296_v59 = vld [vmem:[#allocation21_spill] sm:$0xff] }
 0x1a5   :  { %3366 = vmatprep.subr.bf16.mxu1 %v6288_v17  ;;  %v6297_v17 = vld [vmem:[#allocation24_spill] sm:$0xff] }
 0x1a7   :  { %1456 = vmatmul.mubr.f32.vlgmr.msra.gmra.mrb[0].mxu1 %v5086_v61 }
 0x1a8   :  { %3368 = vmatpush1.bf16.msra.mxu1 %v6289_v0  ;;  %1593 = vmatprep.mubr.f32.mxu1 %v6290_v32  ;;  %v6299_v0 = vld [vmem:[#allocation30_spill] sm:$0xff]  ;;  %v6301_v32 = vld [vmem:[#allocation36_spill] sm:$0xff] }
 0x1a9   :  { %3370 = vmatprep.subr.bf16.mxu1 %v6291_v45  ;;  %v6302_v45 = vld [vmem:[#allocation39_spill] sm:$0xff] }
 0x1ac   :  { %3372 = vmatpush1.bf16.msra.mxu1 %v6292_v37  ;;  %v6303_v37 = vld [vmem:[#allocation42_spill] sm:$0xff] }
 0x1ad   :  { %3374 = vmatprep.subr.bf16.mxu1 %v6293_v56  ;;  %v6304_v56 = vld [vmem:[#allocation44_spill] sm:$0xff] }
 0x1b0   :  { %3376 = vmatpush1.bf16.msra.mxu1 %v6294_v41  ;;  %v6305_v41 = vld [vmem:[#allocation48_spill] sm:$0xff] }
 0x1b1   :  { %3378 = vmatprep.subr.bf16.mxu1 %v6295_v47  ;;  %v6306_v47 = vld [vmem:[#allocation53_spill] sm:$0xff] }
 0x1b4   :  { %3380 = vmatpush1.bf16.msra.mxu1 %v6296_v59  ;;  %v6307_v59 = vld [vmem:[#allocation54_spill] sm:$0xff] }
 0x1b5   :  { %3382 = vmatprep.subr.bf16.mxu1 %v6297_v17  ;;  %v6308_v17 = vld [vmem:[#allocation55_spill] sm:$0xff] }
 0x1b8   :  { %3384 = vmatpush1.bf16.msra.mxu1 %v6298_v36  ;;  %v6309_v36 = vld [vmem:[#allocation62_spill] sm:$0xff] }
 0x1b9   :  { %3386 = vmatprep.subr.bf16.mxu1 %v6299_v0  ;;  %v6310_v0 = vld [vmem:[#allocation63_spill] sm:$0xff] }
 0x1bc   :  { %3388 = vmatpush1.bf16.msra.mxu1 %v6300_v14  ;;  %v6311_v14 = vld [vmem:[#allocation64_spill] sm:$0xff] }
 0x1bd   :  { %3390 = vmatprep.subr.bf16.mxu1 %v6301_v32  ;;  %v6312_v32 = vld [vmem:[#allocation65_spill] sm:$0xff] }
 0x1c0   :  { %3392 = vmatpush1.bf16.msra.mxu1 %v6302_v45  ;;  %v6313_v45 = vld [vmem:[#allocation66_spill] sm:$0xff] }
 0x1c1   :  { %3394 = vmatprep.subr.bf16.mxu1 %v6303_v37  ;;  %v6314_v37 = vld [vmem:[#allocation68_spill] sm:$0xff] }
 0x1c4   :  { %3396 = vmatpush1.bf16.msra.mxu1 %v6304_v56 }
 0x1c5   :  { %3398 = vmatprep.subr.bf16.mxu1 %v6305_v41 }
 0x1c8   :  { %3400 = vmatpush1.bf16.msra.mxu1 %v6306_v47 }
 0x1c9   :  { %3402 = vmatprep.subr.bf16.mxu1 %v6307_v59 }
 0x1cc   :  { %3404 = vmatpush1.bf16.msra.mxu1 %v6308_v17  ;;  %v2009_v17 = vld [vmem:[#allocation7 + $0x10] sm:$0xff] }
 0x1cd   :  { %3406 = vmatprep.subr.bf16.mxu1 %v6309_v36 }
 0x1d0   :  { %3408 = vmatpush1.bf16.msra.mxu1 %v6310_v0  ;;  %v6315_v0 = vand.u32 4294901760, %v4077_v25  ;;  %v2023_v25 = vld [vmem:[#allocation7 + $0x80] sm:$0xff] }
 0x1d1   :  { %3410 = vmatprep.subr.bf16.mxu1 %v6311_v14  ;;  %v6316_v14 = vand.u32 4294901760, %v4084_v29  ;;  %v2007_v29 = vld [vmem:[#allocation7] sm:$0xff] }
 0x1d3   :  { %v3429_v36 = vpack.c.bf16 %v6316_v14, %v6315_v0 }
 0x1d4   :  { %3412 = vmatpush1.bf16.msra.mxu1 %v6312_v32  ;;  %v2024_v32 = vld [vmem:[#allocation7 + $0x88] sm:$0xff] }
 0x1d5   :  { %3414 = vmatprep.subr.bf16.mxu1 %v6313_v45  ;;  %v6317_v45 = vand.u32 4294901760, %v4089_v30  ;;  %v6322_v30 = vand.u32 4294901760, %v4111_v40  ;;  %v2095_v0 = vand.u32 4294901760, %v2024_v32  ;;  %v2010_v40 = vld [vmem:[#allocation7 + $0x18] sm:$0xff] }
 0x1d8   :  { %3416 = vmatpush1.bf16.msra.mxu1 %v6314_v37  ;;  %v6318_v37 = vand.u32 4294901760, %v4094_v31  ;;  %v6323_v31 = vand.u32 4294901760, %v4125_v52 }
 0x1d9   :  { %3418 = vmatprep.subr.bf16.mxu1 %v4993_v27 }
 0x1da   :  { %v3431_v27 = vpack.c.bf16 %v6318_v37, %v6317_v45  ;;  %v3435_v45 = vpack.c.bf16 %v6323_v31, %v6322_v30  ;;  %v2044_v37 = vand.u32 4294901760, %v2007_v29  ;;  %v5223_v30 = vsub.f32 %v2024_v32, %v2095_v0 }
 0x1dc   :  { %3420 = vmatpush1.bf16.msra.mxu1 %v5030_v39  ;;  %v6319_v39 = vand.u32 4294901760, %v4099_v35  ;;  %v2008_v35 = vld [vmem:[#allocation7 + $0x8] sm:$0xff]  ;;  %v5225_v31 = vsub.f32 %v2007_v29, %v2044_v37  ;;  %v2053_v29 = vand.u32 4294901760, %v2010_v40 }
 0x1dd   :  { %3422 = vmatprep.subr.bf16.mxu1 %v5044_v51  ;;  %v6320_v51 = vand.u32 4294901760, %v4105_v38  ;;  %v2025_v38 = vld [vmem:[#allocation7 + $0x90] sm:$0xff] }
 0x1de   :  { %v2098_v14 = vand.u32 4294901760, %v2025_v38 }
 0x1e0   :  { %3424 = vmatpush1.bf16.msra.mxu1 %v5053_v21  ;;  %v3433_v21 = vpack.c.bf16 %v6320_v51, %v6319_v39  ;;  %v2026_v39 = vld [vmem:[#allocation7 + $0x98] sm:$0xff]  ;;  %v6324_v51 = vand.u32 4294901760, %v4174_v4 }
 0x1e1   :  { %3426 = vmatprep.subr.bf16.mxu1 %v5058_v44  ;;  %v6321_v44 = vand.u32 4294901760, %v5086_v61 }
 0x1e4   :  { %3428 = vmatpush1.bf16.msra.mxu1 %v5061_v63  ;;  %v2101_v63 = vand.u32 4294901760, %v2026_v39 }
 0x1e5   :  { %3430 = vmatprep.subr.bf16.mxu1 %v3429_v36  ;;  %v2092_v36 = vand.u32 4294901760, %v2023_v25 }
 0x1e6   :  { %v5231_v4 = vpack.c.bf16 %v2101_v63, %v2098_v14  ;;  %v5240_v32 = vsub.f32 %v2026_v39, %v2101_v63  ;;  %v6334_v63 = vand.u32 4294901760, %v4249_v46  ;;  %v6340_v46 = vand.u32 4294901760, %v4358_v60 }
 0x1e7   :  { %1597 = vmatmul.mubr.f32.vlgmr.msra.gmra.mrb[0].mxu1 %v6321_v44  ;;  %v6325_v44 = vand.u32 4294901760, %v4189_v24  ;;  %v5219_v59 = vpack.c.bf16 %v2095_v0, %v2092_v36  ;;  %v5221_v52 = vsub.f32 %v2023_v25, %v2092_v36  ;;  %v5233_v24 = vsub.f32 %v2025_v38, %v2098_v14 }
 0x1e8   :  { %3432 = vmatpush1.bf16.msra.mxu1 %v3431_v27  ;;  %1860 = vmatprep.mubr.f32.mxu1 %v5079_v23  ;;  %v2047_v27 = vand.u32 4294901760, %v2008_v35  ;;  %6328 = vst [vmem:[#allocation22_spill] sm:$0xff] %v5231_v4  ;;  %v2050_v25 = vand.u32 4294901760, %v2009_v17  ;;  %v6331_v36 = vand.u32 4294901760, %v4220_v50  ;;  %v6332_v0 = vand.u32 4294901760, %v4230_v13 }
 0x1e9   :  { %3434 = vmatprep.subr.bf16.mxu1 %v3433_v21  ;;  %v3437_v61 = vpack.c.bf16 %v6325_v44, %v6324_v51  ;;  %6326 = vst [vmem:[#allocation19_spill] sm:$0xff] %v5219_v59  ;;  %v6329_v51 = vand.u32 4294901760, %v4200_v43  ;;  %v6330_v44 = vand.u32 4294901760, %v4215_v48  ;;  %3558 = vmatprep.subr.bf16.mxu0 %v5219_v59  ;;  %v6336_v50 = vand.u32 4294901760, %v4307_v3 }
 0x1ea   :  { %v5227_v47 = vpack.c.bf16 %v2047_v27, %v2044_v37  ;;  %v5229_v21 = vsub.f32 %v2008_v35, %v2047_v27  ;;  %v3441_v35 = vpack.c.bf16 %v6332_v0, %v6331_v36  ;;  %v5248_v43 = vpack.c.bf16 %v2053_v29, %v2050_v25  ;;  %v6351_v36 = vld [vmem:[#allocation26_spill] sm:$0xff] }
 0x1eb   :  { %v3439_v41 = vpack.c.bf16 %v6330_v44, %v6329_v51  ;;  %v5250_v48 = vsub.f32 %v2009_v17, %v2050_v25  ;;  %v6335_v37 = vand.u32 4294901760, %v4260_v58  ;;  %v6337_v13 = vand.u32 4294901760, %v4312_v8  ;;  %v6347_v44 = vld [vmem:[#allocation23_spill] sm:$0xff] }
 0x1ec   :  { %6327 = vst [vmem:[#allocation20_spill] sm:$0xff] %v5227_v47  ;;  %3436 = vmatpush1.bf16.msra.mxu1 %v3435_v45  ;;  %3560 = vmatpush3.bf16.msra.mxu0 %v5227_v47  ;;  %6333 = vst [vmem:[#allocation46_spill] sm:$0xff] %v5248_v43  ;;  %v5252_v45 = vsub.f32 %v2010_v40, %v2053_v29  ;;  %v6338_v17 = vand.u32 4294901760, %v4326_v55  ;;  %v6341_v58 = vand.u32 4294901760, %v4363_v10  ;;  %v6342_v3 = vand.u32 4294901760, %v4383_v54  ;;  %v6349_v10 = vld [vmem:[#allocation25_spill] sm:$0xff] }
 0x1ed   :  { %3438 = vmatprep.subr.bf16.mxu1 %v3437_v61  ;;  %3562 = vmatprep.subr.bf16.mxu0 %v5231_v4  ;;  %v3443_v38 = vpack.c.bf16 %v6335_v37, %v6334_v63  ;;  %v3445_v39 = vpack.c.bf16 %v6337_v13, %v6336_v50  ;;  %v6339_v61 = vand.u32 4294901760, %v4347_v62  ;;  %v6343_v8 = vand.u32 4294901760, %v4388_v16  ;;  %v6353_v16 = vld [vmem:[#allocation28_spill] sm:$0xff]  ;;  %v6355_v63 = vld [vmem:[#allocation29_spill] sm:$0xff] }
 0x1ee   :  { %v6344_v40 = vand.u32 4294901760, %v6260_v9  ;;  %v6345_v55 = vand.u32 4294901760, %v6261_v7  ;;  %v6346_v62 = vand.u32 4294901760, %v6262_v33  ;;  %v6348_v60 = vand.u32 4294901760, %v6347_v44  ;;  %v6357_v7 = vld [vmem:[#allocation31_spill] sm:$0xff]  ;;  %v6359_v50 = vld [vmem:[#allocation33_spill] sm:$0xff] }
 0x1ef   :  { %v3447_v27 = vpack.c.bf16 %v6339_v61, %v6338_v17  ;;  %v3451_v14 = vpack.c.bf16 %v6343_v8, %v6342_v3  ;;  %v6350_v29 = vand.u32 4294901760, %v6349_v10  ;;  %v6352_v54 = vand.u32 4294901760, %v6351_v36  ;;  %v6363_v61 = vld [vmem:[#allocation35_spill] sm:$0xff]  ;;  %v6367_v3 = vld [vmem:[#allocation38_spill] sm:$0xff]  ;;  %v6375_v10 = vld [vmem:[#allocation45_spill] sm:$0xff] }
 0x1f0   :  { %3440 = vmatpush1.bf16.msra.mxu1 %v3439_v41  ;;  %3564 = vmatpush3.bf16.msra.mxu0 %v5248_v43  ;;  %v3449_v41 = vpack.c.bf16 %v6341_v58, %v6340_v46  ;;  %v3453_v51 = vpack.c.bf16 %v6345_v55, %v6344_v40  ;;  %v3455_v25 = vpack.c.bf16 %v6348_v60, %v6346_v62  ;;  %v6356_v9 = vand.u32 4294901760, %v6355_v63  ;;  %v6365_v58 = vld [vmem:[#allocation37_spill] sm:$0xff]  ;;  %v6369_v40 = vld [vmem:[#allocation40_spill] sm:$0xff]  ;;  %v6373_v60 = vld [vmem:[#allocation43_spill] sm:$0xff] }
 0x1f1   :  { %3442 = vmatprep.subr.bf16.mxu1 %v3441_v35  ;;  %v3457_v0 = vpack.c.bf16 %v6352_v54, %v6350_v29  ;;  %v6354_v35 = vand.u32 4294901760, %v6353_v16  ;;  %v6360_v33 = vand.u32 4294901760, %v6359_v50  ;;  %v6368_v8 = vand.u32 4294901760, %v6367_v3  ;;  %v6398_v3 = vld [vmem:[#allocation70_spill] sm:$0xff] }
 0x1f2   :  { %v6370_v55 = vand.u32 4294901760, %v6369_v40  ;;  %v6376_v29 = vand.u32 4294901760, %v6375_v10  ;;  %v6377_v54 = vand.u32 4294901760, %v6275_v22  ;;  %v6380_v63 = vand.u32 4294901760, %v6277_v26  ;;  %v6413_v10 = vld [vmem:[#allocation27_spill] sm:$0xff] }
 0x1f3   :  { %v3459_v37 = vpack.c.bf16 %v6356_v9, %v6354_v35  ;;  %v6381_v9 = vand.u32 4294901760, %v6278_v53  ;;  %v6385_v22 = vand.u32 4294901760, %v6282_v1  ;;  %v6387_v26 = vand.u32 4294901760, %v6284_v5 }
 0x1f4   :  { %3444 = vmatpush1.bf16.msra.mxu1 %v3443_v38  ;;  %v6358_v38 = vand.u32 4294901760, %v6357_v7  ;;  %v6382_v7 = vand.u32 4294901760, %v6279_v28  ;;  %v6388_v53 = vand.u32 4294901760, %v6285_v12  ;;  %v6389_v28 = vand.u32 4294901760, %v6286_v57 }
 0x1f5   :  { %3446 = vmatprep.subr.bf16.mxu1 %v3445_v39  ;;  %v6361_v39 = vld [vmem:[#allocation34_spill] sm:$0xff]  ;;  %v6392_v1 = vand.u32 4294901760, %v4948_v2  ;;  %v6394_v5 = vand.u32 4294901760, %v4964_v6  ;;  %v6397_v57 = vand.u32 4294901760, %v4987_v20 }
 0x1f6   :  { %v3461_v13 = vpack.c.bf16 %v6360_v33, %v6358_v38  ;;  %v6362_v17 = vand.u32 4294901760, %v6361_v39  ;;  %v6383_v38 = vand.u32 4294901760, %v6280_v49  ;;  %v6384_v33 = vand.u32 4294901760, %v6281_v18  ;;  %v6404_v6 = vld [vmem:[#allocation78_spill] sm:$0xff] }
 0x1f7   :  { %v6386_v39 = vand.u32 4294901760, %v6283_v34  ;;  %v6390_v49 = vand.u32 4294901760, %v4879_v42  ;;  %v6391_v18 = vand.u32 4294901760, %v4884_v11  ;;  %v6393_v34 = vand.u32 4294901760, %v4953_v15  ;;  %v6403_v15 = vld [vmem:[#allocation12_spill] sm:$0xff]  ;;  %v6406_v20 = vld [vmem:[#allocation14_spill] sm:$0xff] }
 0x1f8   :  { %3448 = vmatpush1.bf16.msra.mxu1 %v3447_v27  ;;  %v6364_v27 = vand.u32 4294901760, %v6363_v61  ;;  %v3475_v50 = vpack.c.bf16 %v6383_v38, %v6382_v7  ;;  %v3481_v61 = vpack.c.bf16 %v6389_v28, %v6388_v53  ;;  %v6399_v42 = vand.u32 4294901760, %v6398_v3  ;;  %v6422_v7 = vld [vmem:[#allocation55_spill] sm:$0xff]  ;;  %v6423_v38 = vld [vmem:[#allocation62_spill] sm:$0xff] }
 0x1f9   :  { %3450 = vmatprep.subr.bf16.mxu1 %v3449_v41  ;;  %v6366_v41 = vand.u32 4294901760, %v6365_v58  ;;  %v6395_v58 = vld [vmem:[#allocation67_spill] sm:$0xff]  ;;  %v6400_v11 = vand.u32 4294901760, %v5013_v19  ;;  %v6409_v19 = vld [vmem:[#allocation17_spill] sm:$0xff]  ;;  %v6432_v53 = vld [vmem:[#allocation74_spill] sm:$0xff] }
 0x1fa   :  { %v3463_v46 = vpack.c.bf16 %v6364_v27, %v6362_v17  ;;  %v3479_v17 = vpack.c.bf16 %v6387_v26, %v6386_v39  ;;  %v3483_v27 = vpack.c.bf16 %v6391_v18, %v6390_v49  ;;  %v6396_v12 = vand.u32 4294901760, %v6395_v58  ;;  %v6428_v39 = vld [vmem:[#allocation68_spill] sm:$0xff]  ;;  %v6433_v28 = vld [vmem:[#allocation75_spill] sm:$0xff]  ;;  %v2028_v18 = vld [vmem:[#allocation7 + $0xa8] sm:$0xff] }
 0x1fb   :  { %v6430_v26 = vld [vmem:[#allocation72_spill] sm:$0xff]  ;;  %v2030_v3 = vld [vmem:[#allocation7 + $0xb8] sm:$0xff] }
 0x1fc   :  { %3452 = vmatpush1.bf16.msra.mxu1 %v3451_v14  ;;  %v3465_v14 = vpack.c.bf16 %v6368_v8, %v6366_v41  ;;  %v3487_v41 = vpack.c.bf16 %v6396_v12, %v6394_v5  ;;  %v3489_v8 = vpack.c.bf16 %v6399_v42, %v6397_v57  ;;  %v2027_v49 = vld [vmem:[#allocation7 + $0xa0] sm:$0xff]  ;;  %v2029_v57 = vld [vmem:[#allocation7 + $0xb0] sm:$0xff] }
 0x1fd   :  { %3454 = vmatprep.subr.bf16.mxu1 %v3453_v51  ;;  %v6371_v51 = vld [vmem:[#allocation41_spill] sm:$0xff]  ;;  %v2110_v42 = vand.u32 4294901760, %v2029_v57 }
 0x1fe   :  { %v6372_v62 = vand.u32 4294901760, %v6371_v51  ;;  %v6407_v51 = vld [vmem:[#allocation15_spill] sm:$0xff] }
 0x200   :  { %3456 = vmatpush1.bf16.msra.mxu1 %v3455_v25  ;;  %v3467_v44 = vpack.c.bf16 %v6372_v62, %v6370_v55  ;;  %v6374_v25 = vand.u32 4294901760, %v6373_v60  ;;  %v6405_v55 = vld [vmem:[#allocation13_spill] sm:$0xff]  ;;  %v6408_v62 = vld [vmem:[#allocation16_spill] sm:$0xff] }
 0x201   :  { %3458 = vmatprep.subr.bf16.mxu1 %v3457_v0  ;;  %v6378_v0 = vld [vmem:[#allocation47_spill] sm:$0xff]  ;;  %v6411_v60 = vld [vmem:[#allocation21_spill] sm:$0xff] }
 0x202   :  { %v3469_v36 = vpack.c.bf16 %v6376_v29, %v6374_v25  ;;  %v6379_v16 = vand.u32 4294901760, %v6378_v0  ;;  %v6412_v25 = vld [vmem:[#allocation24_spill] sm:$0xff]  ;;  %v6414_v29 = vld [vmem:[#allocation30_spill] sm:$0xff] }
 0x203   :  { %v6418_v0 = vld [vmem:[#allocation42_spill] sm:$0xff] }
 0x204   :  { %3460 = vmatpush1.bf16.msra.mxu1 %v3459_v37  ;;  %v3471_v35 = vpack.c.bf16 %v6379_v16, %v6377_v54  ;;  %v3473_v37 = vpack.c.bf16 %v6381_v9, %v6380_v63  ;;  %v6417_v54 = vld [vmem:[#allocation39_spill] sm:$0xff]  ;;  %v6419_v63 = vld [vmem:[#allocation48_spill] sm:$0xff]  ;;  %v6420_v9 = vld [vmem:[#allocation53_spill] sm:$0xff] }
 0x205   :  { %3462 = vmatprep.subr.bf16.mxu1 %v3461_v13  ;;  %v3477_v13 = vpack.c.bf16 %v6385_v22, %v6384_v33  ;;  %v6425_v33 = vld [vmem:[#allocation64_spill] sm:$0xff]  ;;  %v6426_v22 = vld [vmem:[#allocation65_spill] sm:$0xff] }
 0x208   :  { %3464 = vmatpush1.bf16.msra.mxu1 %v3463_v46  ;;  %v3485_v46 = vpack.c.bf16 %v6393_v34, %v6392_v1  ;;  %v2107_v1 = vand.u32 4294901760, %v2028_v18  ;;  %v2011_v34 = vld [vmem:[#allocation7 + $0x20] sm:$0xff] }
 0x209   :  { %3466 = vmatprep.subr.bf16.mxu1 %v3465_v14  ;;  %v6401_v14 = vld [vmem:[#allocation71_spill] sm:$0xff]  ;;  %v2056_v5 = vand.u32 4294901760, %v2011_v34 }
 0x20a   :  { %v6402_v2 = vand.u32 4294901760, %v6401_v14  ;;  %v2014_v14 = vld [vmem:[#allocation7 + $0x38] sm:$0xff] }
 0x20c   :  { %3468 = vmatpush1.bf16.msra.mxu1 %v3467_v44  ;;  %v3491_v40 = vpack.c.bf16 %v6402_v2, %v6400_v11  ;;  %v6410_v44 = vld [vmem:[#allocation18_spill] sm:$0xff] }
 0x20d   :  { %3470 = vmatprep.subr.bf16.mxu1 %v3469_v36  ;;  %v6415_v36 = vld [vmem:[#allocation32_spill] sm:$0xff]  ;;  %v2013_v11 = vld [vmem:[#allocation7 + $0x30] sm:$0xff] }
 0x20e   :  { %v2062_v2 = vand.u32 4294901760, %v2013_v11 }
 0x210   :  { %3472 = vmatpush1.bf16.msra.mxu1 %v3471_v35 }
 0x211   :  { %3474 = vmatprep.subr.bf16.mxu1 %v3473_v37  ;;  %v6421_v37 = vld [vmem:[#allocation54_spill] sm:$0xff] }
 0x214   :  { %3476 = vmatpush1.bf16.msra.mxu1 %v3475_v50  ;;  %v6424_v50 = vld [vmem:[#allocation63_spill] sm:$0xff] }
 0x215   :  { %3478 = vmatprep.subr.bf16.mxu1 %v3477_v13  ;;  %v6427_v13 = vld [vmem:[#allocation66_spill] sm:$0xff] }
 0x218   :  { %3480 = vmatpush1.bf16.msra.mxu1 %v3479_v17  ;;  %v6431_v17 = vld [vmem:[#allocation73_spill] sm:$0xff] }
 0x219   :  { %3482 = vmatprep.subr.bf16.mxu1 %v3481_v61  ;;  %v6434_v61 = vld [vmem:[#allocation76_spill] sm:$0xff] }
 0x21c   :  { %3484 = vmatpush1.bf16.msra.mxu1 %v3483_v27  ;;  %v2104_v27 = vand.u32 4294901760, %v2027_v49 }
 0x21d   :  { %3486 = vmatprep.subr.bf16.mxu1 %v3485_v46  ;;  %v2012_v46 = vld [vmem:[#allocation7 + $0x28] sm:$0xff] }
 0x21e   :  { %v2059_v58 = vand.u32 4294901760, %v2012_v46  ;;  %v5394_v12 = vpack.c.bf16 %v2107_v1, %v2104_v27 }
 0x220   :  { %3488 = vmatpush1.bf16.msra.mxu1 %v3487_v41  ;;  %6435 = vst [vmem:[#allocation49_spill] sm:$0xff] %v5394_v12  ;;  %v5396_v41 = vpack.c.bf16 %v2059_v58, %v2056_v5  ;;  %3566 = vmatprep.subr.bf16.mxu0 %v5394_v12 }
 0x221   :  { %3490 = vmatprep.subr.bf16.mxu1 %v3489_v8  ;;  %v2113_v8 = vand.u32 4294901760, %v2030_v3 }
 0x222   :  { %6436 = vst [vmem:[#allocation50_spill] sm:$0xff] %v5396_v41  ;;  %3568 = vmatpush3.bf16.msra.mxu0 %v5396_v41  ;;  %v5432_v41 = vsub.f32 %v2013_v11, %v2062_v2 }
 0x224   :  { %3492 = vmatpush1.bf16.msra.mxu1 %v3491_v40  ;;  %v2065_v40 = vand.u32 4294901760, %v2014_v14 }
 0x225   :  { %3494 = vmatprep.subr.bf16.mxu1 %v6403_v15  ;;  %v5400_v15 = vpack.c.bf16 %v2113_v8, %v2110_v42 }
 0x226   :  { %v5434_v12 = vsub.f32 %v2014_v14, %v2065_v40 }
 0x227   :  { %1862 = vmatmul.mubr.f32.vlgmr.msra.gmra.mrb[0].mxu1 %v6404_v6  ;;  %6437 = vst [vmem:[#allocation51_spill] sm:$0xff] %v5400_v15  ;;  %3570 = vmatprep.subr.bf16.mxu0 %v5400_v15  ;;  %v5428_v15 = vsub.f32 %v2029_v57, %v2110_v42  ;;  %v2022_v42 = vld [vmem:[#allocation7 + $0x78] sm:$0xff] }
 0x228   :  { %3496 = vmatpush1.bf16.msra.mxu1 %v6405_v55  ;;  %1997 = vmatprep.mubr.f32.mxu1 %v5079_v23  ;;  %v6416_v23 = vld [vmem:[#allocation36_spill] sm:$0xff]  ;;  %6444 = vst [vmem:[#allocation61_spill] sm:$0xff] %v5434_v12 }
 0x229   :  { %3498 = vmatprep.subr.bf16.mxu1 %v6406_v20  ;;  %v2031_v55 = vld [vmem:[#allocation7 + $0xc0] sm:$0xff]  ;;  %v2032_v20 = vld [vmem:[#allocation7 + $0xc8] sm:$0xff] }
 0x22c   :  { %3500 = vmatpush1.bf16.msra.mxu1 %v6407_v51  ;;  %v2116_v51 = vand.u32 4294901760, %v2031_v55 }
 0x22d   :  { %3502 = vmatprep.subr.bf16.mxu1 %v6408_v62  ;;  %v2119_v62 = vand.u32 4294901760, %v2032_v20 }
 0x230   :  { %3504 = vmatpush1.bf16.msra.mxu1 %v6409_v19  ;;  %v2015_v19 = vld [vmem:[#allocation7 + $0x40] sm:$0xff] }
 0x231   :  { %3506 = vmatprep.subr.bf16.mxu1 %v6410_v44  ;;  %v2016_v44 = vld [vmem:[#allocation7 + $0x48] sm:$0xff] }
 0x234   :  { %3508 = vmatpush1.bf16.msra.mxu1 %v6411_v60  ;;  %v2068_v60 = vand.u32 4294901760, %v2015_v19 }
 0x235   :  { %3510 = vmatprep.subr.bf16.mxu1 %v6412_v25  ;;  %v2071_v25 = vand.u32 4294901760, %v2016_v44 }
 0x238   :  { %3512 = vmatpush1.bf16.msra.mxu1 %v6413_v10  ;;  %v5406_v10 = vpack.c.bf16 %v2119_v62, %v2116_v51 }
 0x239   :  { %3514 = vmatprep.subr.bf16.mxu1 %v6414_v29  ;;  %v5408_v29 = vpack.c.bf16 %v2071_v25, %v2068_v60 }
 0x23a   :  { %6439 = vst [vmem:[#allocation56_spill] sm:$0xff] %v5406_v10 }
 0x23b   :  { %6440 = vst [vmem:[#allocation57_spill] sm:$0xff] %v5408_v29 }
 0x23c   :  { %3516 = vmatpush1.bf16.msra.mxu1 %v6415_v36  ;;  %v2033_v36 = vld [vmem:[#allocation7 + $0xd0] sm:$0xff] }
 0x23d   :  { %3518 = vmatprep.subr.bf16.mxu1 %v6416_v23  ;;  %v2034_v23 = vld [vmem:[#allocation7 + $0xd8] sm:$0xff] }
 0x240   :  { %3520 = vmatpush1.bf16.msra.mxu1 %v6417_v54  ;;  %v2122_v54 = vand.u32 4294901760, %v2033_v36 }
 0x241   :  { %3522 = vmatprep.subr.bf16.mxu1 %v6418_v0  ;;  %v2125_v0 = vand.u32 4294901760, %v2034_v23 }
 0x242   :  { %v5372_v16 = vpop.f32.mrb[2].mxu0 }
 0x243   :  { %v5374_v35 = vpop.f32.mrb[3].mxu0 }
 0x244   :  { %3524 = vmatpush1.bf16.msra.mxu1 %v6304_v56  ;;  %v6429_v56 = vld [vmem:[#allocation69_spill] sm:$0xff] }
 0x245   :  { %3526 = vmatprep.subr.bf16.mxu1 %v6419_v63  ;;  %v2017_v63 = vld [vmem:[#allocation7 + $0x50] sm:$0xff] }
 0x248   :  { %3528 = vmatpush1.bf16.msra.mxu1 %v6420_v9  ;;  %v2018_v9 = vld [vmem:[#allocation7 + $0x58] sm:$0xff] }
 0x249   :  { %3530 = vmatprep.subr.bf16.mxu1 %v6421_v37  ;;  %v2074_v37 = vand.u32 4294901760, %v2017_v63 }
 0x24b   :  { %v5449_v57 = vsub.f32 %v2017_v63, %v2074_v37 }
 0x24c   :  { %3532 = vmatpush1.bf16.msra.mxu1 %v6422_v7  ;;  %v2077_v7 = vand.u32 4294901760, %v2018_v9 }
 0x24d   :  { %3534 = vmatprep.subr.bf16.mxu1 %v6423_v38  ;;  %v5412_v38 = vpack.c.bf16 %v2125_v0, %v2122_v54  ;;  %6451 = vst [vmem:[#allocation31_spill] sm:$0xff] %v5449_v57 }
 0x24f   :  { %6441 = vst [vmem:[#allocation58_spill] sm:$0xff] %v5412_v38 }
 0x250   :  { %3536 = vmatpush1.bf16.msra.mxu1 %v6424_v50  ;;  %v5414_v50 = vpack.c.bf16 %v2077_v7, %v2074_v37 }
 0x251   :  { %3538 = vmatprep.subr.bf16.mxu1 %v6425_v33  ;;  %v2035_v33 = vld [vmem:[#allocation7 + $0xe0] sm:$0xff] }
 0x252   :  { %6442 = vst [vmem:[#allocation59_spill] sm:$0xff] %v5414_v50 }
 0x254   :  { %3540 = vmatpush1.bf16.msra.mxu1 %v6426_v22  ;;  %v2036_v22 = vld [vmem:[#allocation7 + $0xe8] sm:$0xff] }
 0x255   :  { %3542 = vmatprep.subr.bf16.mxu1 %v6427_v13  ;;  %v2128_v13 = vand.u32 4294901760, %v2035_v33 }
 0x258   :  { %3544 = vmatpush1.bf16.msra.mxu1 %v6428_v39  ;;  %v2131_v39 = vand.u32 4294901760, %v2036_v22 }
 0x259   :  { %3546 = vmatprep.subr.bf16.mxu1 %v6429_v56  ;;  %v2019_v56 = vld [vmem:[#allocation7 + $0x60] sm:$0xff] }
 0x25a   :  { %v5455_v11 = vsub.f32 %v2036_v22, %v2131_v39  ;;  %v6044_v22 = vand.u32 4294901760, %v5233_v24 }
 0x25c   :  { %3548 = vmatpush1.bf16.msra.mxu1 %v6430_v26  ;;  %v2020_v26 = vld [vmem:[#allocation7 + $0x68] sm:$0xff]  ;;  %6454 = vst [vmem:[#allocation35_spill] sm:$0xff] %v5455_v11 }
 0x25d   :  { %3550 = vmatprep.subr.bf16.mxu1 %v6431_v17  ;;  %v5418_v17 = vpack.c.bf16 %v2131_v39, %v2128_v13 }
 0x25f   :  { %6443 = vst [vmem:[#allocation60_spill] sm:$0xff] %v5418_v17 }
 0x260   :  { %3552 = vmatpush1.bf16.msra.mxu1 %v6432_v53  ;;  %v2080_v53 = vand.u32 4294901760, %v2019_v56 }
 0x261   :  { %3554 = vmatprep.subr.bf16.mxu1 %v6433_v28  ;;  %v2083_v28 = vand.u32 4294901760, %v2020_v26 }
 0x263   :  { %v5457_v14 = vpack.c.bf16 %v2083_v28, %v2080_v53 }
 0x264   :  { %3556 = vmatpush1.bf16.msra.mxu1 %v6434_v61  ;;  %v5420_v61 = vsub.f32 %v2027_v49, %v2104_v27  ;;  %v5439_v49 = vsub.f32 %v2032_v20, %v2119_v62  ;;  %v5443_v27 = vsub.f32 %v2016_v44, %v2071_v25  ;;  %v2089_v62 = vand.u32 4294901760, %v2022_v42 }
 0x265   :  { %6455 = vst [vmem:[#allocation37_spill] sm:$0xff] %v5457_v14  ;;  %v6056_v44 = vand.u32 4294901760, %v5223_v30 }
 0x266   :  { %6446 = vst [vmem:[#allocation23_spill] sm:$0xff] %v5439_v49  ;;  %6448 = vst [vmem:[#allocation26_spill] sm:$0xff] %v5443_v27  ;;  %v5477_v63 = vsub.f32 %v2022_v42, %v2089_v62 }
 0x267   :  { %1999 = vmatmul.mubr.f32.vlgmr.msra.gmra.mrb[0].mxu1 %v6404_v6  ;;  %v5402_v6 = vpack.c.bf16 %v2065_v40, %v2062_v2  ;;  %v5459_v2 = vsub.f32 %v2019_v56, %v2080_v53  ;;  %v5461_v40 = vsub.f32 %v2020_v26, %v2083_v28  ;;  %v2278_v37 = vsub.f32 %v5223_v30, %v6056_v44 }
 0x268   :  { %6463 = vst [vmem:[#allocation70_spill] sm:$0xff] %v5477_v63  ;;  %v6046_v26 = vand.u32 4294901760, %v5250_v48  ;;  %v6053_v53 = vand.u32 4294901760, %v5252_v45 }
 0x269   :  { %6438 = vst [vmem:[#allocation52_spill] sm:$0xff] %v5402_v6  ;;  %3572 = vmatpush3.bf16.msra.mxu0 %v5402_v6  ;;  %v5426_v6 = vsub.f32 %v2012_v46, %v2059_v58  ;;  %v2021_v46 = vld [vmem:[#allocation7 + $0x70] sm:$0xff]  ;;  %v5447_v58 = vsub.f32 %v2034_v23, %v2125_v0  ;;  %6456 = vst [vmem:[#allocation38_spill] sm:$0xff] %v5459_v2  ;;  %v2279_v56 = vand.u32 4294901760, %v2278_v37 }
 0x26a   :  { %3574 = vmatprep.subr.bf16.mxu0 %v5406_v10  ;;  %v5424_v10 = vsub.f32 %v2011_v34, %v2056_v5  ;;  %v2038_v34 = vld [vmem:[#allocation7 + $0xf8] sm:$0xff]  ;;  %v5445_v5 = vsub.f32 %v2033_v36, %v2122_v54  ;;  %6457 = vst [vmem:[#allocation40_spill] sm:$0xff] %v5461_v40 }
 0x26b   :  { %6450 = vst [vmem:[#allocation29_spill] sm:$0xff] %v5447_v58  ;;  %v2137_v20 = vand.u32 4294901760, %v2038_v34 }
 0x26c   :  { %6449 = vst [vmem:[#allocation28_spill] sm:$0xff] %v5445_v5 }
 0x26d   :  { %3576 = vmatpush3.bf16.msra.mxu0 %v5408_v29  ;;  %v5422_v29 = vsub.f32 %v2028_v18, %v2107_v1  ;;  %v5441_v18 = vsub.f32 %v2015_v19, %v2068_v60  ;;  %v2037_v1 = vld [vmem:[#allocation7 + $0xf0] sm:$0xff]  ;;  %v6057_v19 = vand.u32 4294901760, %v5221_v52  ;;  %v6054_v60 = vand.u32 4294901760, %v5225_v31 }
 0x26e   :  { %3578 = vmatprep.subr.bf16.mxu0 %v5412_v38  ;;  %v5430_v38 = vsub.f32 %v2030_v3, %v2113_v8  ;;  %v5451_v3 = vsub.f32 %v2018_v9, %v2077_v7  ;;  %v5453_v8 = vsub.f32 %v2035_v33, %v2128_v13  ;;  %v5471_v23 = vsub.f32 %v2038_v34, %v2137_v20 }
 0x26f   :  { %6447 = vst [vmem:[#allocation25_spill] sm:$0xff] %v5441_v18  ;;  %v2271_v9 = vsub.f32 %v5221_v52, %v6057_v19  ;;  %v2159_v7 = vsub.f32 %v5225_v31, %v6054_v60  ;;  %v6045_v33 = vand.u32 4294901760, %v5229_v21  ;;  %v6047_v13 = vand.u32 4294901760, %v5240_v32 }
 0x270   :  { %6452 = vst [vmem:[#allocation33_spill] sm:$0xff] %v5451_v3  ;;  %6453 = vst [vmem:[#allocation34_spill] sm:$0xff] %v5453_v8  ;;  %v2285_v34 = vsub.f32 %v5233_v24, %v6044_v22 }
 0x271   :  { %3580 = vmatpush3.bf16.msra.mxu0 %v5414_v50  ;;  %v5437_v50 = vsub.f32 %v2031_v55, %v2116_v51  ;;  %v2134_v55 = vand.u32 4294901760, %v2037_v1  ;;  %v2086_v51 = vand.u32 4294901760, %v2021_v46  ;;  %6460 = vst [vmem:[#allocation45_spill] sm:$0xff] %v5471_v23  ;;  %v2272_v39 = vand.u32 4294901760, %v2271_v9 }
 0x272   :  { %3582 = vmatprep.subr.bf16.mxu0 %v5418_v17  ;;  %v2160_v28 = vand.u32 4294901760, %v2159_v7  ;;  %v2286_v9 = vand.u32 4294901760, %v2285_v34  ;;  %v6051_v7 = vand.u32 4294901760, %v5422_v29  ;;  %v6050_v34 = vand.u32 4294901760, %v5426_v6 }
 0x273   :  { %6445 = vst [vmem:[#allocation44_spill] sm:$0xff] %v5437_v50  ;;  %v5467_v25 = vpack.c.bf16 %v2137_v20, %v2134_v55  ;;  %v5469_v36 = vsub.f32 %v2037_v1, %v2134_v55  ;;  %v5473_v54 = vsub.f32 %v2021_v46, %v2086_v51  ;;  %v5475_v0 = vpack.c.bf16 %v2089_v62, %v2086_v51 }
 0x274   :  { %v2166_v1 = vsub.f32 %v5229_v21, %v6045_v33  ;;  %v2292_v46 = vsub.f32 %v5240_v32, %v6047_v13  ;;  %v3589_v42 = vpack.c.bf16 %v2279_v56, %v2272_v39  ;;  %v2173_v55 = vsub.f32 %v5250_v48, %v6046_v26 }
 0x275   :  { %3584 = vmatpush3.bf16.msra.mxu0 %v5457_v14  ;;  %6458 = vst [vmem:[#allocation41_spill] sm:$0xff] %v5467_v25  ;;  %6459 = vst [vmem:[#allocation43_spill] sm:$0xff] %v5469_v36  ;;  %v2180_v20 = vsub.f32 %v5252_v45, %v6053_v53  ;;  %v6048_v51 = vand.u32 4294901760, %v5420_v61  ;;  %v6049_v56 = vand.u32 4294901760, %v5424_v10  ;;  %v6090_v17 = vand.u32 4294901760, %v5477_v63 }
 0x276   :  { %6461 = vst [vmem:[#allocation47_spill] sm:$0xff] %v5473_v54  ;;  %6462 = vst [vmem:[#allocation67_spill] sm:$0xff] %v5475_v0  ;;  %3586 = vmatprep.subr.bf16.mxu0 %v5467_v25  ;;  %v2167_v62 = vand.u32 4294901760, %v2166_v1  ;;  %v2293_v37 = vand.u32 4294901760, %v2292_v46  ;;  %v2174_v22 = vand.u32 4294901760, %v2173_v55  ;;  %v2306_v1 = vsub.f32 %v5422_v29, %v6051_v7 }
 0x277   :  { %v2181_v33 = vand.u32 4294901760, %v2180_v20  ;;  %v2299_v39 = vsub.f32 %v5420_v61, %v6048_v51  ;;  %v2187_v55 = vsub.f32 %v5424_v10, %v6049_v56  ;;  %v6052_v20 = vand.u32 4294901760, %v5428_v15 }
 0x278   :  { %v5516_v26 = vpack.c.bf16 %v2167_v62, %v2160_v28  ;;  %v5518_v13 = vpack.c.bf16 %v2293_v37, %v2286_v9  ;;  %v2307_v51 = vand.u32 4294901760, %v2306_v1  ;;  %v2194_v28 = vsub.f32 %v5426_v6, %v6050_v34 }
 0x279   :  { %3588 = vmatpush3.bf16.msra.mxu0 %v5475_v0  ;;  %v5524_v46 = vpack.c.bf16 %v2181_v33, %v2174_v22  ;;  %v6055_v62 = vand.u32 4294901760, %v5430_v38  ;;  %v6059_v9 = vand.u32 4294901760, %v5432_v41  ;;  %v2188_v37 = vand.u32 4294901760, %v2187_v55 }
 0x27a   :  { %3590 = vmatprep.subr.bf16.mxu0 %v3589_v42  ;;  %v2300_v42 = vand.u32 4294901760, %v2299_v39  ;;  %v2313_v33 = vsub.f32 %v5428_v15, %v6052_v20  ;;  %v6058_v22 = vand.u32 4294901760, %v5434_v12  ;;  %v6060_v39 = vand.u32 4294901760, %v5437_v50 }
 0x27b   :  { %v2195_v1 = vand.u32 4294901760, %v2194_v28  ;;  %v2320_v34 = vsub.f32 %v5430_v38, %v6055_v62  ;;  %v2201_v7 = vsub.f32 %v5432_v41, %v6059_v9  ;;  %v6062_v62 = vand.u32 4294901760, %v5441_v18 }
 0x27c   :  { %v5540_v56 = vpack.c.bf16 %v2307_v51, %v2300_v42  ;;  %v2314_v55 = vand.u32 4294901760, %v2313_v33  ;;  %v2208_v20 = vsub.f32 %v5434_v12, %v6058_v22  ;;  %v2327_v53 = vsub.f32 %v5437_v50, %v6060_v39 }
 0x27d   :  { %v6061_v51 = vand.u32 4294901760, %v5439_v49  ;;  %v5555_v42 = vpack.c.bf16 %v2195_v1, %v2188_v37  ;;  %v2321_v28 = vand.u32 4294901760, %v2320_v34  ;;  %v2202_v60 = vand.u32 4294901760, %v2201_v7 }
 0x27e   :  { %v2209_v44 = vand.u32 4294901760, %v2208_v20  ;;  %v2328_v19 = vand.u32 4294901760, %v2327_v53  ;;  %v6063_v22 = vand.u32 4294901760, %v5443_v27  ;;  %v2215_v39 = vsub.f32 %v5441_v18, %v6062_v62 }
 0x27f   :  { %v2334_v33 = vsub.f32 %v5439_v49, %v6061_v51  ;;  %v5562_v9 = vpack.c.bf16 %v2321_v28, %v2314_v55  ;;  %v6066_v37 = vand.u32 4294901760, %v5445_v5  ;;  %v6069_v7 = vand.u32 4294901760, %v5447_v58 }
 0x280   :  { %v5569_v34 = vpack.c.bf16 %v2209_v44, %v2202_v60  ;;  %v2222_v53 = vsub.f32 %v5443_v27, %v6063_v22  ;;  %v6072_v1 = vand.u32 4294901760, %v5449_v57  ;;  %v2216_v51 = vand.u32 4294901760, %v2215_v39 }
 0x281   :  { %v2335_v20 = vand.u32 4294901760, %v2334_v33  ;;  %v2341_v55 = vsub.f32 %v5445_v5, %v6066_v37  ;;  %v2348_v28 = vsub.f32 %v5447_v58, %v6069_v7  ;;  %v6073_v62 = vand.u32 4294901760, %v5451_v3 }
 0x282   :  { %v2223_v60 = vand.u32 4294901760, %v2222_v53  ;;  %v2229_v33 = vsub.f32 %v5449_v57, %v6072_v1  ;;  %v6074_v22 = vand.u32 4294901760, %v5453_v8  ;;  %v6075_v25 = vand.u32 4294901760, %v5455_v11 }
 0x283   :  { %v5582_v44 = vpack.c.bf16 %v2335_v20, %v2328_v19  ;;  %v2342_v39 = vand.u32 4294901760, %v2341_v55  ;;  %v2349_v0 = vand.u32 4294901760, %v2348_v28  ;;  %v2236_v37 = vsub.f32 %v5451_v3, %v6073_v62 }
 0x284   :  { %v5592_v7 = vpack.c.bf16 %v2223_v60, %v2216_v51  ;;  %v2230_v14 = vand.u32 4294901760, %v2229_v33  ;;  %v2355_v19 = vsub.f32 %v5453_v8, %v6074_v22  ;;  %v6076_v20 = vand.u32 4294901760, %v5459_v2 }
 0x285   :  { %v5598_v53 = vpack.c.bf16 %v2349_v0, %v2342_v39  ;;  %v2237_v1 = vand.u32 4294901760, %v2236_v37  ;;  %v2362_v55 = vsub.f32 %v5455_v11, %v6075_v25  ;;  %v6079_v28 = vand.u32 4294901760, %v5461_v40 }
 0x286   :  { %v2356_v62 = vand.u32 4294901760, %v2355_v19  ;;  %v2243_v51 = vsub.f32 %v5459_v2, %v6076_v20  ;;  %v6082_v60 = vand.u32 4294901760, %v5469_v36  ;;  %v6089_v33 = vand.u32 4294901760, %v5471_v23 }
 0x287   :  { %v5609_v22 = vpack.c.bf16 %v2237_v1, %v2230_v14  ;;  %v2363_v0 = vand.u32 4294901760, %v2362_v55  ;;  %v2250_v37 = vsub.f32 %v5461_v40, %v6079_v28  ;;  %v6091_v39 = vand.u32 4294901760, %v5473_v54 }
 0x288   :  { %v2244_v25 = vand.u32 4294901760, %v2243_v51  ;;  %v2369_v19 = vsub.f32 %v5469_v36, %v6082_v60  ;;  %v2376_v20 = vsub.f32 %v5471_v23, %v6089_v33  ;;  %v2264_v51 = vsub.f32 %v5477_v63, %v6090_v17 }
 0x289   :  { %v5622_v14 = vpack.c.bf16 %v2363_v0, %v2356_v62  ;;  %v2251_v1 = vand.u32 4294901760, %v2250_v37  ;;  %v2257_v55 = vsub.f32 %v5473_v54, %v6091_v39  ;;  %v3621_v62 = vpack.c.bf16 %v5223_v30, %v5221_v52 }
 0x28a   :  { %v2370_v28 = vand.u32 4294901760, %v2369_v19  ;;  %v2377_v43 = vand.u32 4294901760, %v2376_v20  ;;  %v2265_v59 = vand.u32 4294901760, %v2264_v51  ;;  %v3623_v0 = vpack.c.bf16 %v5229_v21, %v5225_v31 }
 0x28b   :  { %v3615_v60 = vpack.c.bf16 %v2251_v1, %v2244_v25  ;;  %v2258_v4 = vand.u32 4294901760, %v2257_v55  ;;  %v3625_v37 = vpack.c.bf16 %v5240_v32, %v5233_v24  ;;  %v3627_v20 = vpack.c.bf16 %v5252_v45, %v5250_v48 }
 0x28c   :  { %v3617_v47 = vpack.c.bf16 %v2377_v43, %v2370_v28  ;;  %v3629_v19 = vpack.c.bf16 %v5422_v29, %v5420_v61  ;;  %v3631_v43 = vpack.c.bf16 %v5426_v6, %v5424_v10  ;;  %v3637_v25 = vpack.c.bf16 %v5439_v49, %v5437_v50 }
 0x28d   :  { %v3619_v33 = vpack.c.bf16 %v2265_v59, %v2258_v4  ;;  %v3633_v59 = vpack.c.bf16 %v5430_v38, %v5428_v15  ;;  %v3635_v4 = vpack.c.bf16 %v5434_v12, %v5432_v41  ;;  %v3639_v28 = vpack.c.bf16 %v5443_v27, %v5441_v18  ;;  %v2913_v27 = vld [vmem:[%s5810_s4 + $0x1] ss:$4 sm:$0x3] }
 0x28e   :  { %v3641_v1 = vpack.c.bf16 %v5447_v58, %v5445_v5  ;;  %v3643_v55 = vpack.c.bf16 %v5451_v3, %v5449_v57  ;;  %v3645_v51 = vpack.c.bf16 %v5455_v11, %v5453_v8  ;;  %v3647_v17 = vpack.c.bf16 %v5461_v40, %v5459_v2  ;;  %v6464_v58 = vld [vmem:[#allocation77_spill] sm:$0xff] }
 0x28f   :  { %v3649_v39 = vpack.c.bf16 %v5471_v23, %v5469_v36  ;;  %v3651_v49 = vpack.c.bf16 %v5477_v63, %v5473_v54  ;;  %v6465_v5 = vsub.s32 0, %v6464_v58  ;;  %v6466_v3 = vsub.s32 1, %v6464_v58 }
 0x291   :  { %v714_v18 = vrot.slane %v2913_v27, %v6465_v5  ;;  %v718_v57 = vrot.slane %v2913_v27, %v6466_v3 }
 0x293   :  { %v862_v11 = vadd.f32 %v5372_v16, %v714_v18  ;;  %v864_v40 = vadd.f32 %v5374_v35, %v718_v57 }
 0x33a   :  { %v2000_v2 = vpop.f32.mrb[0].mxu1 }
 0x33b   :  { %v3752_v8 = vadd.f32 %v2000_v2, %v862_v11  ;;  %v2002_v23 = vpop.f32.mrb[1].mxu1  ;;  %v6469_v11 = vld [vmem:[#allocation22_spill] sm:$0xff] }
 0x33c   :  { %v3754_v36 = vadd.f32 %v2002_v23, %v864_v40  ;;  %v6470_v2 = vld [vmem:[#allocation46_spill] sm:$0xff]  ;;  %v6471_v40 = vld [vmem:[#allocation49_spill] sm:$0xff]  ;;  %v6473_v23 = vld [vmem:[#allocation51_spill] sm:$0xff] }
 0x33d   :  { %3786 = vtanh.f32 %v3752_v8  ;;  %v6468_v8 = vld [vmem:[#allocation20_spill] sm:$0xff] }
 0x33e   :  { %3788 = vtanh.f32 %v3754_v36  ;;  %v6472_v36 = vld [vmem:[#allocation50_spill] sm:$0xff] }
 0x347   :  { %v3787_v63 = vpop.eup %3786 }
 0x348   :  { %v3789_v54 = vpop.eup %3788  ;;  %v5671_v50 = vand.u32 4294901760, %v3787_v63 }
 0x349   :  { %v5673_v12 = vand.u32 4294901760, %v3789_v54 }
 0x34a   :  { %v5676_v5 = vsub.f32 %v3787_v63, %v5671_v50  ;;  %v6477_v63 = vld [vmem:[#allocation58_spill] sm:$0xff] }
 0x34b   :  { %v2140_v27 = vsub.f32 %v3789_v54, %v5673_v12  ;;  %v6476_v54 = vld [vmem:[#allocation57_spill] sm:$0xff] }
 0x34c   :  { %v2147_v16 = vand.u32 4294901760, %v5676_v5 }
 0x34d   :  { %v2141_v35 = vand.u32 4294901760, %v2140_v27 }
 0x34e   :  { %v2148_v18 = vsub.f32 %v5676_v5, %v2147_v16 }
 0x34f   :  { %v2142_v58 = vsub.f32 %v2140_v27, %v2141_v35 }
 0x350   :  { %v2149_v3 = vand.u32 4294901760, %v2148_v18  ;;  %v6514_v18 = vld [vmem:[#allocation33_spill] sm:$0xff] }
 0x351   :  { %v2143_v57 = vand.u32 4294901760, %v2142_v58  ;;  %v6515_v58 = vand.u32 4294901760, %v6514_v18 }
 0x353   :  { %2144 = vmatprep.mubr.f32.mxu0 %v2143_v57 }
 0x354   :  { %2150 = vmatmul.mubr.f32.vlgmr.msra.gmra.mrb[4].mxu0 %v2149_v3  ;;  %v6516_v3 = vld [vmem:[#allocation34_spill] sm:$0xff] }
 0x355   :  { %3592 = vmatpush3.bf16.msra.mxu0 %v5516_v26  ;;  %2380 = vmatprep.mubr.f32.mxu0 %v5673_v12  ;;  %v6479_v26 = vld [vmem:[#allocation60_spill] sm:$0xff] }
 0x356   :  { %3594 = vmatprep.subr.bf16.mxu0 %v5518_v13  ;;  %v6478_v13 = vld [vmem:[#allocation59_spill] sm:$0xff] }
 0x359   :  { %3596 = vmatpush3.bf16.msra.mxu0 %v5524_v46  ;;  %v6481_v46 = vld [vmem:[#allocation41_spill] sm:$0xff] }
 0x35a   :  { %3598 = vmatprep.subr.bf16.mxu0 %v5540_v56  ;;  %v6480_v56 = vld [vmem:[#allocation37_spill] sm:$0xff] }
 0x35d   :  { %3600 = vmatpush3.bf16.msra.mxu0 %v5555_v42 }
 0x35e   :  { %3602 = vmatprep.subr.bf16.mxu0 %v5562_v9  ;;  %v6482_v9 = vand.u32 4294901760, %v5221_v52  ;;  %v6489_v52 = vand.u32 4294901760, %v5250_v48  ;;  %v6496_v48 = vand.u32 4294901760, %v5430_v38  ;;  %v6508_v38 = vld [vmem:[#allocation28_spill] sm:$0xff] }
 0x361   :  { %3604 = vmatpush3.bf16.msra.mxu0 %v5569_v34  ;;  %v6485_v34 = vand.u32 4294901760, %v5225_v31 }
 0x362   :  { %3606 = vmatprep.subr.bf16.mxu0 %v5582_v44  ;;  %v6486_v44 = vand.u32 4294901760, %v5229_v21  ;;  %v6491_v21 = vand.u32 4294901760, %v5420_v61 }
 0x365   :  { %3608 = vmatpush3.bf16.msra.mxu0 %v5592_v7  ;;  %v6484_v7 = vld [vmem:[#allocation67_spill] sm:$0xff] }
 0x366   :  { %3610 = vmatprep.subr.bf16.mxu0 %v5598_v53  ;;  %v3687_v53 = vpack.c.bf16 %v6486_v44, %v6485_v34  ;;  %v6520_v44 = vld [vmem:[#allocation38_spill] sm:$0xff] }
 0x369   :  { %3612 = vmatpush3.bf16.msra.mxu0 %v5609_v22  ;;  %v6483_v22 = vand.u32 4294901760, %v5223_v30  ;;  %v6490_v30 = vand.u32 4294901760, %v5252_v45  ;;  %v6497_v45 = vand.u32 4294901760, %v5432_v41 }
 0x36a   :  { %3614 = vmatprep.subr.bf16.mxu0 %v5622_v14  ;;  %v6492_v14 = vand.u32 4294901760, %v5422_v29  ;;  %v6500_v29 = vld [vmem:[#allocation44_spill] sm:$0xff] }
 0x36b   :  { %v3685_v42 = vpack.c.bf16 %v6483_v22, %v6482_v9  ;;  %v3691_v31 = vpack.c.bf16 %v6490_v30, %v6489_v52  ;;  %v6517_v9 = vand.u32 4294901760, %v6516_v3  ;;  %v6518_v22 = vld [vmem:[#allocation35_spill] sm:$0xff] }
 0x36c   :  { %v6524_v52 = vld [vmem:[#allocation43_spill] sm:$0xff] }
 0x36d   :  { %3616 = vmatpush3.bf16.msra.mxu0 %v3615_v60  ;;  %v6487_v60 = vand.u32 4294901760, %v5233_v24  ;;  %v3693_v24 = vpack.c.bf16 %v6492_v14, %v6491_v21  ;;  %v6525_v30 = vand.u32 4294901760, %v6524_v52 }
 0x36e   :  { %3618 = vmatprep.subr.bf16.mxu0 %v3617_v47  ;;  %v6467_v47 = vld [vmem:[#allocation19_spill] sm:$0xff] }
 0x371   :  { %3620 = vmatpush3.bf16.msra.mxu0 %v3619_v33  ;;  %v6488_v33 = vand.u32 4294901760, %v5240_v32  ;;  %v6493_v32 = vand.u32 4294901760, %v5424_v10 }
 0x372   :  { %3622 = vmatprep.subr.bf16.mxu0 %v3621_v62  ;;  %v6494_v62 = vand.u32 4294901760, %v5426_v6  ;;  %v6504_v6 = vld [vmem:[#allocation25_spill] sm:$0xff] }
 0x374   :  { %2382 = vmatmul.mubr.f32.vlgmr.msra.gmra.mrb[6].mxu0 %v5671_v50 }
 0x375   :  { %3624 = vmatpush3.bf16.msra.mxu0 %v3623_v0  ;;  %2517 = vmatprep.mubr.f32.mxu0 %v2140_v27  ;;  %v3695_v0 = vpack.c.bf16 %v6494_v62, %v6493_v32  ;;  %v6530_v62 = vld [vmem:[#allocation70_spill] sm:$0xff] }
 0x376   :  { %3626 = vmatprep.subr.bf16.mxu0 %v3625_v37  ;;  %v6495_v37 = vand.u32 4294901760, %v5428_v15 }
 0x379   :  { %3628 = vmatpush3.bf16.msra.mxu0 %v3627_v20  ;;  %v3697_v20 = vpack.c.bf16 %v6496_v48, %v6495_v37 }
 0x37a   :  { %3630 = vmatprep.subr.bf16.mxu0 %v3629_v19  ;;  %v6498_v19 = vld [vmem:[#allocation61_spill] sm:$0xff] }
 0x37b   :  { %v6499_v61 = vand.u32 4294901760, %v6498_v19 }
 0x37d   :  { %3632 = vmatpush3.bf16.msra.mxu0 %v3631_v43  ;;  %v3699_v43 = vpack.c.bf16 %v6499_v61, %v6497_v45 }
 0x37e   :  { %3634 = vmatprep.subr.bf16.mxu0 %v3633_v59  ;;  %v6501_v59 = vand.u32 4294901760, %v6500_v29 }
 0x381   :  { %3636 = vmatpush3.bf16.msra.mxu0 %v3635_v4  ;;  %v6502_v4 = vld [vmem:[#allocation23_spill] sm:$0xff] }
 0x382   :  { %3638 = vmatprep.subr.bf16.mxu0 %v3637_v25  ;;  %v6503_v10 = vand.u32 4294901760, %v6502_v4 }
 0x384   :  { %v3701_v25 = vpack.c.bf16 %v6503_v10, %v6501_v59 }
 0x385   :  { %3640 = vmatpush3.bf16.msra.mxu0 %v3639_v28  ;;  %v6505_v28 = vand.u32 4294901760, %v6504_v6 }
 0x386   :  { %3642 = vmatprep.subr.bf16.mxu0 %v3641_v1  ;;  %v6506_v1 = vld [vmem:[#allocation26_spill] sm:$0xff] }
 0x387   :  { %v6507_v15 = vand.u32 4294901760, %v6506_v1 }
 0x389   :  { %3644 = vmatpush3.bf16.msra.mxu0 %v3643_v55  ;;  %v3703_v55 = vpack.c.bf16 %v6507_v15, %v6505_v28 }
 0x38a   :  { %3646 = vmatprep.subr.bf16.mxu0 %v3645_v51  ;;  %v6509_v51 = vand.u32 4294901760, %v6508_v38 }
 0x38d   :  { %3648 = vmatpush3.bf16.msra.mxu0 %v3647_v17  ;;  %v6474_v17 = vld [vmem:[#allocation52_spill] sm:$0xff] }
 0x38e   :  { %3650 = vmatprep.subr.bf16.mxu0 %v3649_v39  ;;  %v3689_v39 = vpack.c.bf16 %v6488_v33, %v6487_v60  ;;  %v6522_v60 = vld [vmem:[#allocation40_spill] sm:$0xff] }
 0x38f   :  { %v6523_v33 = vand.u32 4294901760, %v6522_v60 }
 0x391   :  { %3652 = vmatpush3.bf16.msra.mxu0 %v3651_v49  ;;  %v6475_v49 = vld [vmem:[#allocation56_spill] sm:$0xff] }
 0x392   :  { %3654 = vmatprep.subr.bf16.mxu0 %v6467_v47 }
 0x394   :  { %2520 = vmatmul.mubr.f32.vlgmr.msra.gmra.mrb[8].mxu0 %v5676_v5  ;;  %v6510_v5 = vld [vmem:[#allocation29_spill] sm:$0xff] }
 0x395   :  { %3656 = vmatpush3.bf16.msra.mxu0 %v6468_v8  ;;  %2624 = vmatprep.mubr.f32.mxu0 %v2141_v35  ;;  %v6511_v41 = vand.u32 4294901760, %v6510_v5 }
 0x396   :  { %3658 = vmatprep.subr.bf16.mxu0 %v6469_v11 }
 0x397   :  { %v3705_v27 = vpack.c.bf16 %v6511_v41, %v6509_v51 }
 0x399   :  { %3660 = vmatpush3.bf16.msra.mxu0 %v6470_v2 }
 0x39a   :  { %3662 = vmatprep.subr.bf16.mxu0 %v6471_v40 }
 0x39d   :  { %3664 = vmatpush3.bf16.msra.mxu0 %v6472_v36 }
 0x39e   :  { %3666 = vmatprep.subr.bf16.mxu0 %v6473_v23 }
 0x3a1   :  { %3668 = vmatpush3.bf16.msra.mxu0 %v6474_v17 }
 0x3a2   :  { %3670 = vmatprep.subr.bf16.mxu0 %v6475_v49 }
 0x3a5   :  { %3672 = vmatpush3.bf16.msra.mxu0 %v6476_v54 }
 0x3a6   :  { %3674 = vmatprep.subr.bf16.mxu0 %v6477_v63 }
 0x3a9   :  { %3676 = vmatpush3.bf16.msra.mxu0 %v6478_v13 }
 0x3aa   :  { %3678 = vmatprep.subr.bf16.mxu0 %v6479_v26 }
 0x3ad   :  { %3680 = vmatpush3.bf16.msra.mxu0 %v6480_v56 }
 0x3ae   :  { %3682 = vmatprep.subr.bf16.mxu0 %v6481_v46 }
 0x3b1   :  { %3684 = vmatpush3.bf16.msra.mxu0 %v6484_v7 }
 0x3b2   :  { %3686 = vmatprep.subr.bf16.mxu0 %v3685_v42  ;;  %v6519_v42 = vand.u32 4294901760, %v6518_v22 }
 0x3b4   :  { %2628 = vmatmul.mubr.f32.vlgmr.msra.gmra.mrb[10].mxu0 %v2147_v16  ;;  %v6512_v16 = vld [vmem:[#allocation31_spill] sm:$0xff]  ;;  %v3709_v34 = vpack.c.bf16 %v6519_v42, %v6517_v9 }
 0x3b5   :  { %3688 = vmatpush3.bf16.msra.mxu0 %v3687_v53  ;;  %2794 = vmatprep.mubr.f32.mxu0 %v5673_v12  ;;  %v6513_v35 = vand.u32 4294901760, %v6512_v16  ;;  %v6521_v53 = vand.u32 4294901760, %v6520_v44 }
 0x3b6   :  { %3690 = vmatprep.subr.bf16.mxu0 %v3689_v39 }
 0x3b7   :  { %v3707_v57 = vpack.c.bf16 %v6515_v58, %v6513_v35  ;;  %v3711_v39 = vpack.c.bf16 %v6523_v33, %v6521_v53 }
 0x3b9   :  { %3692 = vmatpush3.bf16.msra.mxu0 %v3691_v31  ;;  %v6526_v31 = vld [vmem:[#allocation45_spill] sm:$0xff] }
 0x3ba   :  { %3694 = vmatprep.subr.bf16.mxu0 %v3693_v24  ;;  %v6527_v21 = vand.u32 4294901760, %v6526_v31  ;;  %v6528_v24 = vld [vmem:[#allocation47_spill] sm:$0xff] }
 0x3bb   :  { %v6529_v32 = vand.u32 4294901760, %v6528_v24 }
 0x3bc   :  { %v3713_v14 = vpack.c.bf16 %v6527_v21, %v6525_v30 }
 0x3bd   :  { %3696 = vmatpush3.bf16.msra.mxu0 %v3695_v0  ;;  %v6531_v0 = vand.u32 4294901760, %v6530_v62 }
 0x3be   :  { %3698 = vmatprep.subr.bf16.mxu0 %v3697_v20 }
 0x3bf   :  { %v3715_v37 = vpack.c.bf16 %v6531_v0, %v6529_v32 }
 0x3c1   :  { %3700 = vmatpush3.bf16.msra.mxu0 %v3699_v43 }
 0x3c2   :  { %3702 = vmatprep.subr.bf16.mxu0 %v3701_v25 }
 0x3c5   :  { %3704 = vmatpush3.bf16.msra.mxu0 %v3703_v55 }
 0x3c6   :  { %3706 = vmatprep.subr.bf16.mxu0 %v3705_v27 }
 0x3c9   :  { %3708 = vmatpush3.bf16.msra.mxu0 %v3707_v57 }
 0x3ca   :  { %3710 = vmatprep.subr.bf16.mxu0 %v3709_v34 }
 0x3cd   :  { %3712 = vmatpush3.bf16.msra.mxu0 %v3711_v39 }
 0x3ce   :  { %3714 = vmatprep.subr.bf16.mxu0 %v3713_v14 }
 0x3d1   :  { %3716 = vmatpush3.bf16.msra.mxu0 %v3715_v37 }
 0x3d2   :  { %3718 = vmatprep.subr.bf16.mxu0 %v6467_v47 }
 0x3d4   :  { %2796 = vmatmul.mubr.f32.vlgmr.msra.gmra.mrb[12].mxu0 %v5671_v50 }
 0x3d5   :  { %3720 = vmatpush3.bf16.msra.mxu0 %v6468_v8  ;;  %2898 = vmatprep.mubr.f32.mxu0 %v5673_v12 }
 0x3d6   :  { %3722 = vmatprep.subr.bf16.mxu0 %v6469_v11  ;;  %v2914_v11 = vld [vmem:[%s5810_s4 + $0x2] ss:$0 sm:$0xff] }
 0x3d9   :  { %3724 = vmatpush3.bf16.msra.mxu0 %v6470_v2 }
 0x3da   :  { %3726 = vmatprep.subr.bf16.mxu0 %v6471_v40 }
 0x3dd   :  { %3728 = vmatpush3.bf16.msra.mxu0 %v6472_v36 }
 0x3de   :  { %3730 = vmatprep.subr.bf16.mxu0 %v6473_v23 }
 0x3e1   :  { %3732 = vmatpush3.bf16.msra.mxu0 %v6474_v17 }
 0x3e2   :  { %3734 = vmatprep.subr.bf16.mxu0 %v6475_v49 }
 0x3e5   :  { %3736 = vmatpush3.bf16.msra.mxu0 %v6476_v54 }
 0x3e6   :  { %3738 = vmatprep.subr.bf16.mxu0 %v6477_v63 }
 0x3e9   :  { %3740 = vmatpush3.bf16.msra.mxu0 %v6478_v13 }
 0x3ea   :  { %3742 = vmatprep.subr.bf16.mxu0 %v6479_v26 }
 0x3ed   :  { %3744 = vmatpush3.bf16.msra.mxu0 %v6480_v56 }
 0x3ee   :  { %3746 = vmatprep.subr.bf16.mxu0 %v6481_v46 }
 0x3f1   :  { %3748 = vmatpush3.bf16.msra.mxu0 %v6484_v7 }
 0x3f4   :  { %2900 = vmatmul.mubr.f32.vlgmr.msra.gmra.mrb[14].mxu0 %v5671_v50 }
 0x427   :  { %v2947_v12 = vpop.f32.mrb[4].mxu0 }
 0x428   :  { %v2948_v47 = vpop.f32.mrb[5].mxu0 }
 0x429   :  { %v2949_v8 = vadd.f32 %v2948_v47, %v2947_v12 }
 0x42b   :  { %v2152_v36 = vadd.f32 %v2949_v8, %v2914_v11 }
 0x447   :  { %v2982_v2 = vpop.f32.mrb[6].mxu0 }
 0x448   :  { %v2983_v40 = vpop.f32.mrb[7].mxu0 }
 0x449   :  { %v2984_v23 = vadd.f32 %v2983_v40, %v2982_v2 }
 0x44b   :  { %v2384_v17 = vadd.f32 %v2984_v23, %v2152_v36 }
 0x467   :  { %v3017_v49 = vpop.f32.mrb[8].mxu0 }
 0x468   :  { %v3018_v54 = vpop.f32.mrb[9].mxu0 }
 0x469   :  { %v3019_v63 = vadd.f32 %v3018_v54, %v3017_v49 }
 0x46b   :  { %v2522_v13 = vadd.f32 %v3019_v63, %v2384_v17 }
 0x487   :  { %v3052_v26 = vpop.f32.mrb[10].mxu0 }
 0x488   :  { %v3053_v56 = vpop.f32.mrb[11].mxu0 }
 0x489   :  { %v3054_v46 = vadd.f32 %v3053_v56, %v3052_v26 }
 0x48b   :  { %v2630_v50 = vadd.f32 %v3054_v46, %v2522_v13 }
 0x4a7   :  { %v3087_v7 = vpop.f32.mrb[12].mxu0 }
 0x4a8   :  { %v3088_v48 = vpop.f32.mrb[13].mxu0 }
 0x4a9   :  { %v3089_v20 = vadd.f32 %v3088_v48, %v3087_v7 }
 0x4ab   :  { %v2798_v45 = vadd.f32 %v3089_v20, %v2630_v50 }
 0x4c7   :  { %v3122_v19 = vpop.f32.mrb[14].mxu0 }
 0x4c8   :  { %v3123_v61 = vpop.f32.mrb[15].mxu0 }
 0x4c9   :  { %v3124_v43 = vadd.f32 %v3123_v61, %v3122_v19 }
 0x4cb   :  { %v2902_v29 = vadd.f32 %v3124_v43, %v2798_v45 }
 0x4cd   :  { %2905 = vst [vmem:[%s5811_s5] sm:$0xff] %v2902_v29 }
 0x4ce   :  { %2910 = vsyncpa [#allocation3], 1 }
 0x4cf   :  { %2911 = vsyncpa [#allocation5], 1 }
 0x4d0   :  { %2912 = vsyncpa [#allocation8], 1 }

</bundles_post_ra>
